<compile_context>
chip_gen: v5e
topology: v5e:2x2
jax: 0.10.0
libtpu: 0.0.40
codegen_flags: <defaults>
</compile_context>

<pallas_src>
import functools

import numpy as np
import jax
import jax.numpy as jnp
from jax.experimental import pallas as pl
from jax.experimental.pallas import tpu as pltpu


# ---------------------------------------------------------------------------
# Fused kernel: out = sigmoid(conv7x7([mean_c(ca), max_c(ca)])) * ca
#               with ca = sigmoid(fc(avg_pool(x)) + fc(max_pool(x))) * x
# ---------------------------------------------------------------------------
def _fused_cbam_kernel(x_ref, w1_ref, w2_ref, wsa_ref, mask_ref, out_ref,
                       mpad_ref, *, H, W, K, margin):
    HW = H * W
    pad = K // 2
    C = x_ref.shape[1]

    # Zero the padded-map scratch once; the interior is fully rewritten every
    # grid step and the margins are never written with non-zero data.
    @pl.when(pl.program_id(0) == 0)
    def _():
        mpad_ref[...] = jnp.zeros_like(mpad_ref)

    # ---------------- channel attention ----------------
    x = x_ref[0].astype(jnp.float32)                      # (C, HW), f32 accumulate
    # AdaptiveAvgPool2d(1) as an MXU dot (lane reduction -> matmul, XLU stays free)
    avg_p = jnp.dot(x, jnp.full((HW, 1), 1.0 / HW, jnp.float32),
                    preferred_element_type=jnp.float32)   # (C, 1)
    # AdaptiveMaxPool2d(1): lane-direction max reduce (XLU)
    max_p = jnp.max(x, axis=-1, keepdims=True)            # (C, 1)

    w1 = w1_ref[...].astype(jnp.float32)                  # (Cr, C)
    w2 = w2_ref[...].astype(jnp.float32)                  # (C, Cr)
    pooled = jnp.concatenate([avg_p, max_p], axis=1)      # (C, 2): both FC branches
    h = jnp.maximum(jnp.dot(w1, pooled, preferred_element_type=jnp.float32), 0.0)
    o = jnp.dot(w2, h, preferred_element_type=jnp.float32)  # (C, 2)
    attn_c = jax.nn.sigmoid(o[:, 0:1] + o[:, 1:2])        # (C, 1)
    ca = x * attn_c                                       # (C, HW), lane broadcast

    # ---------------- spatial attention maps ----------------
    # torch.mean(dim=1) as an MXU dot; torch.max(dim=1) is a sublane reduce (XLU)
    mean_c = jnp.dot(jnp.full((1, C), 1.0 / C, jnp.float32), ca,
                     preferred_element_type=jnp.float32)  # (1, HW)
    max_c = jnp.max(ca, axis=0, keepdims=True)            # (1, HW)
    maps = jnp.concatenate([mean_c, max_c], axis=0)       # (2, HW)

    # Zero-margin padded flattened maps in VMEM scratch.  Shifts by multiples of
    # W (the ky taps) read into the zero margins, reproducing the H-direction
    # zero padding; the W-direction padding is handled by mask_ref below.
    mpad_ref[:, margin:margin + HW] = maps

    # ---------------- 7x7 conv as a tap sum in flattened space ----------------
    acc = jnp.zeros((1, HW), jnp.float32)
    for kx in range(K):
        dx = kx - pad
        t = jnp.zeros((1, HW), jnp.float32)
        for c in range(2):
            for ky in range(K):
                s = (ky - pad) * W + dx                   # static flattened shift
                wt = wsa_ref[c * K * K + ky * K + kx]     # scalar from SMEM
                t = t + wt * mpad_ref[c:c + 1, margin + s:margin + s + HW]
        # column-validity mask for this kx (zero where w + dx falls outside [0, W))
        acc = acc + mask_ref[kx:kx + 1, :] * t
    att = jax.nn.sigmoid(acc)                             # (1, HW)

    # ---------------- fused final scale, lane-dense store ----------------
    out_ref[0] = (ca * att).astype(out_ref.dtype)


# ---------------------------------------------------------------------------
# Wrapper
# ---------------------------------------------------------------------------
def attention_module_forward(x, w1, w2, w_sa, *, kernel_size=7):
    B, C, H, W = x.shape
    Cr = w1.shape[0]
    HW = H * W
    K = kernel_size
    pad = K // 2
    # margin >= max |flattened shift| = pad*W + pad, rounded up to a lane multiple
    margin = ((pad * W + pad + 127) // 128) * 128

    x_flat = x.reshape(B, C, HW)                          # lane-dense big tensor
    w_sa_flat = w_sa.reshape(-1)                          # (2*K*K,) scalars -> SMEM

    # Precomputed column-validity masks, one row per kx tap (host-side constant).
    wcol = np.arange(W)
    mask_np = np.stack(
        [np.tile(((wcol + (kx - pad) >= 0) & (wcol + (kx - pad) < W))
                 .astype(np.float32), H) for kx in range(K)], axis=0)   # (K, HW)
    masks = jnp.asarray(mask_np)

    # Explicit VMEM budget: per-step working set is ~ (in + out) double-buffered
    # blocks of (C, HW).  Cap at 64 MiB so it stays valid on v7x as well.
    blk_bytes = C * HW * max(jnp.dtype(x.dtype).itemsize, 4)
    vmem_limit = int(min(64 * 1024 * 1024, max(32 * 1024 * 1024, 8 * blk_bytes)))
    # TODO(synk): for very large C*HW add a second grid axis tiling C (two-pass
    # accumulation of the pooled stats) to keep double-buffering alive and to
    # use both v7x TensorCores when B == 1.

    kernel = functools.partial(_fused_cbam_kernel, H=H, W=W, K=K, margin=margin)
    out_flat = pl.pallas_call(
        kernel,
        out_shape=jax.ShapeDtypeStruct((B, C, HW), x.dtype),
        grid=(B,),
        in_specs=[
            pl.BlockSpec((1, C, HW), lambda b: (b, 0, 0)),          # x
            pl.BlockSpec((Cr, C), lambda b: (0, 0)),                # fc conv1 weight
            pl.BlockSpec((C, Cr), lambda b: (0, 0)),                # fc conv2 weight
            pl.BlockSpec(memory_space=pltpu.MemorySpace.SMEM),      # spatial conv taps
            pl.BlockSpec((K, HW), lambda b: (0, 0)),                # column masks
        ],
        out_specs=pl.BlockSpec((1, C, HW), lambda b: (b, 0, 0)),
        scratch_shapes=[pltpu.VMEM((2, HW + 2 * margin), jnp.float32)],
        compiler_params=pltpu.CompilerParams(
            dimension_semantics=("parallel",),
            vmem_limit_bytes=vmem_limit),
    )(x_flat, w1, w2, w_sa_flat, masks)

    return out_flat.reshape(B, C, H, W)


# ---------------------------------------------------------------------------
# Pure-numpy reference (mirrors the PyTorch forward exactly)
# ---------------------------------------------------------------------------
def ref_forward_np(x, w1, w2, w_sa, kernel_size=7):
    x = np.asarray(x, np.float32)
    w1 = np.asarray(w1, np.float32)
    w2 = np.asarray(w2, np.float32)
    w_sa = np.asarray(w_sa, np.float32)
    B, C, H, W = x.shape
    pad = kernel_size // 2
    sig = lambda v: 1.0 / (1.0 + np.exp(-v))

    avg = x.mean(axis=(2, 3))                             # (B, C)
    mx = x.max(axis=(2, 3))                               # (B, C)
    fc = lambda p: np.maximum(p @ w1.T, 0.0) @ w2.T
    attn = sig(fc(avg) + fc(mx))                          # (B, C)
    ca = x * attn[:, :, None, None]

    maps = np.stack([ca.mean(axis=1), ca.max(axis=1)], axis=1)   # (B, 2, H, W)
    mp = np.pad(maps, ((0, 0), (0, 0), (pad, pad), (pad, pad)))
    conv = np.zeros((B, H, W), np.float32)
    for c in range(2):
        for ky in range(kernel_size):
            for kx in range(kernel_size):
                conv += w_sa[c, ky, kx] * mp[:, c, ky:ky + H, kx:kx + W]
    sa = sig(conv)[:, None, :, :]
    return ca * sa


if __name__ == "__main__":
    B, C, H, W = 2, 32, 16, 16          # in_channels=32, ratio=16 -> hidden=2
    ratio, K = 16, 7
    Cr = C // ratio

    key = jax.random.PRNGKey(0)
    k1, k2, k3, k4 = jax.random.split(key, 4)
    # deterministic synthetic parameters (shapes from the module's __init__)
    w1 = jax.random.normal(k1, (Cr, C), jnp.float32) * 0.1      # fc conv1: (C//r, C, 1, 1)
    w2 = jax.random.normal(k2, (C, Cr), jnp.float32) * 0.1      # fc conv2: (C, C//r, 1, 1)
    w_sa = jax.random.normal(k3, (2, K, K), jnp.float32) * 0.1  # spatial conv: (1, 2, 7, 7)
    x = jax.random.normal(k4, (B, C, H, W), jnp.float32)

    out = attention_module_forward(x, w1, w2, w_sa, kernel_size=K)
    out = jax.block_until_ready(out)

    ref = ref_forward_np(x, w1, w2, w_sa, kernel_size=K)
    assert out.shape == ref.shape, (out.shape, ref.shape)
    np.testing.assert_allclose(np.asarray(out), ref, rtol=2e-3, atol=2e-3)
    print("KERNEL_OK")
</pallas_src>

<mosaic_0001>
module attributes {stable_mosaic.version = 11 : i64} {
  func.func @_fused_cbam_kernel(%arg0: i32, %arg1: memref<1x32x256xf32, #tpu.memory_space<vmem>>, %arg2: memref<2x32xf32, #tpu.memory_space<vmem>>, %arg3: memref<32x2xf32, #tpu.memory_space<vmem>>, %arg4: memref<98xf32, #tpu.memory_space<smem>>, %arg5: memref<7x256xf32, #tpu.memory_space<vmem>>, %arg6: memref<1x32x256xf32, #tpu.memory_space<vmem>>, %arg7: memref<2x512xf32, #tpu.memory_space<vmem>>) attributes {dimension_semantics = [#tpu.dimension_semantics<parallel>], iteration_bounds = array<i64: 2>, scalar_prefetch = 0 : i64, scratch_operands = 1 : i64, tpu.core_type = #tpu.core_type<tc>, window_params = [{transform_indices = @transform_0, window_bounds = array<i64: 1, 32, 256>}, {pipeline_mode = #tpu.pipeline_mode<synchronous>, transform_indices = @transform_1, window_bounds = array<i64: 2, 32>}, {pipeline_mode = #tpu.pipeline_mode<synchronous>, transform_indices = @transform_2, window_bounds = array<i64: 32, 2>}, {transform_indices = @transform_3, window_bounds = array<i64: 98>}, {pipeline_mode = #tpu.pipeline_mode<synchronous>, transform_indices = @transform_4, window_bounds = array<i64: 7, 256>}, {transform_indices = @transform_5, window_bounds = array<i64: 1, 32, 256>}]} {
    %c0_i32 = arith.constant 0 : i32
    %0 = arith.cmpi eq, %arg0, %c0_i32 : i32
    %1 = arith.extui %0 : i1 to i32
    %c0_i32_0 = arith.constant 0 : i32
    %2 = arith.cmpi ne, %1, %c0_i32_0 : i32
    scf.if %2 {
      %cst_204 = arith.constant 0.000000e+00 : f32
      %561 = vector.broadcast %cst_204 : f32 to vector<2x512xf32>
      %c0_205 = arith.constant 0 : index
      %c0_206 = arith.constant 0 : index
      %562 = vector.load %arg7[%c0_205, %c0_206] : memref<2x512xf32, #tpu.memory_space<vmem>>, vector<2x512xf32>
      tpu.vector_store %arg7[%c0_205, %c0_206], %561 {strides = array<i32>} : memref<2x512xf32, #tpu.memory_space<vmem>>, vector<2x512xf32>,
    } else {
    }
    %c0 = arith.constant 0 : index
    %c0_1 = arith.constant 0 : index
    %c0_2 = arith.constant 0 : index
    %3 = vector.load %arg1[%c0, %c0_1, %c0_2] : memref<1x32x256xf32, #tpu.memory_space<vmem>>, vector<1x32x256xf32>
    %4 = vector.shape_cast %3 : vector<1x32x256xf32> to vector<32x256xf32>
    %cst = arith.constant 3.906250e-03 : f32
    %5 = vector.broadcast %cst : f32 to vector<256x1xf32>
    %cst_3 = arith.constant dense<0.000000e+00> : vector<32x1xf32>
    %6 = tpu.matmul %4, %5, %cst_3 {dimension_numbers = #tpu.dot_dimension_numbers<[1], [0], [0], [1], [0, 0, 1, 1], [], []>} : vector<32x256xf32>, vector<256x1xf32>, vector<32x1xf32> -> vector<32x1xf32>
    %cst_4 = arith.constant dense<0xFF800000> : vector<32xf32>
    %7 = vector.multi_reduction <maximumf>, %4, %cst_4 [1] : vector<32x256xf32> to vector<32xf32>
    %8 = vector.shape_cast %7 : vector<32xf32> to vector<32x1xf32>
    %c0_5 = arith.constant 0 : index
    %c0_6 = arith.constant 0 : index
    %9 = vector.load %arg2[%c0_5, %c0_6] : memref<2x32xf32, #tpu.memory_space<vmem>>, vector<2x32xf32>
    %c0_7 = arith.constant 0 : index
    %c0_8 = arith.constant 0 : index
    %10 = vector.load %arg3[%c0_7, %c0_8] : memref<32x2xf32, #tpu.memory_space<vmem>>, vector<32x2xf32>
    %11 = tpu.concatenate %6, %8 in 1 : vector<32x1xf32>, vector<32x1xf32> -> vector<32x2xf32>
    %cst_9 = arith.constant dense<0.000000e+00> : vector<2x2xf32>
    %12 = tpu.matmul %9, %11, %cst_9 {dimension_numbers = #tpu.dot_dimension_numbers<[1], [0], [0], [1], [0, 0, 1, 1], [], []>} : vector<2x32xf32>, vector<32x2xf32>, vector<2x2xf32> -> vector<2x2xf32>
    %cst_10 = arith.constant 0.000000e+00 : f32
    %13 = vector.broadcast %cst_10 : f32 to vector<2x2xf32>
    %14 = arith.maximumf %12, %13 : vector<2x2xf32>
    %cst_11 = arith.constant dense<0.000000e+00> : vector<32x2xf32>
    %15 = tpu.matmul %10, %14, %cst_11 {dimension_numbers = #tpu.dot_dimension_numbers<[1], [0], [0], [1], [0, 0, 1, 1], [], []>} : vector<32x2xf32>, vector<2x2xf32>, vector<32x2xf32> -> vector<32x2xf32>
    %16 = vector.extract_strided_slice %15 {offsets = [0, 0], sizes = [32, 1], strides = [1, 1]} : vector<32x2xf32> to vector<32x1xf32>
    %17 = vector.extract_strided_slice %15 {offsets = [0, 1], sizes = [32, 1], strides = [1, 1]} : vector<32x2xf32> to vector<32x1xf32>
    %18 = arith.addf %16, %17 : vector<32x1xf32>
    %19 = arith.negf %18 : vector<32x1xf32>
    %20 = math.exp %19 : vector<32x1xf32>
    %cst_12 = arith.constant 1.000000e+00 : f32
    %21 = vector.broadcast %cst_12 : f32 to vector<32x1xf32>
    %22 = arith.addf %21, %20 : vector<32x1xf32>
    %23 = arith.divf %21, %22 : vector<32x1xf32>
    %24 = vector.broadcast %23 : vector<32x1xf32> to vector<32x256xf32>
    %25 = arith.mulf %4, %24 : vector<32x256xf32>
    %cst_13 = arith.constant 3.125000e-02 : f32
    %26 = vector.broadcast %cst_13 : f32 to vector<1x32xf32>
    %cst_14 = arith.constant dense<0.000000e+00> : vector<1x256xf32>
    %27 = tpu.matmul %26, %25, %cst_14 {dimension_numbers = #tpu.dot_dimension_numbers<[1], [0], [0], [1], [0, 0, 1, 1], [], []>} : vector<1x32xf32>, vector<32x256xf32>, vector<1x256xf32> -> vector<1x256xf32>
    %cst_15 = arith.constant dense<0xFF800000> : vector<256xf32>
    %28 = vector.multi_reduction <maximumf>, %25, %cst_15 [0] : vector<32x256xf32> to vector<256xf32>
    %29 = vector.shape_cast %28 : vector<256xf32> to vector<1x256xf32>
    %30 = tpu.concatenate %27, %29 in 0 : vector<1x256xf32>, vector<1x256xf32> -> vector<2x256xf32>
    %c0_16 = arith.constant 0 : index
    %c128 = arith.constant 128 : index
    %31 = vector.load %arg7[%c0_16, %c128] : memref<2x512xf32, #tpu.memory_space<vmem>>, vector<2x256xf32>
    tpu.vector_store %arg7[%c0_16, %c128], %30 {strides = array<i32>} : memref<2x512xf32, #tpu.memory_space<vmem>>, vector<2x256xf32>,
    %cst_17 = arith.constant 0.000000e+00 : f32
    %32 = vector.broadcast %cst_17 : f32 to vector<1x256xf32>
    %cst_18 = arith.constant 0.000000e+00 : f32
    %33 = vector.broadcast %cst_18 : f32 to vector<1x256xf32>
    %c0_19 = arith.constant 0 : index
    %34 = memref.load %arg4[%c0_19] : memref<98xf32, #tpu.memory_space<smem>>
    %c0_20 = arith.constant 0 : index
    %c77 = arith.constant 77 : index
    %35 = vector.load %arg7[%c0_20, %c77] : memref<2x512xf32, #tpu.memory_space<vmem>>, vector<1x256xf32>
    %36 = vector.broadcast %34 : f32 to vector<1x256xf32>
    %37 = arith.mulf %36, %35 : vector<1x256xf32>
    %38 = arith.addf %33, %37 : vector<1x256xf32>
    %c7 = arith.constant 7 : index
    %39 = memref.load %arg4[%c7] : memref<98xf32, #tpu.memory_space<smem>>
    %c0_21 = arith.constant 0 : index
    %c93 = arith.constant 93 : index
    %40 = vector.load %arg7[%c0_21, %c93] : memref<2x512xf32, #tpu.memory_space<vmem>>, vector<1x256xf32>
    %41 = vector.broadcast %39 : f32 to vector<1x256xf32>
    %42 = arith.mulf %41, %40 : vector<1x256xf32>
    %43 = arith.addf %38, %42 : vector<1x256xf32>
    %c14 = arith.constant 14 : index
    %44 = memref.load %arg4[%c14] : memref<98xf32, #tpu.memory_space<smem>>
    %c0_22 = arith.constant 0 : index
    %c109 = arith.constant 109 : index
    %45 = vector.load %arg7[%c0_22, %c109] : memref<2x512xf32, #tpu.memory_space<vmem>>, vector<1x256xf32>
    %46 = vector.broadcast %44 : f32 to vector<1x256xf32>
    %47 = arith.mulf %46, %45 : vector<1x256xf32>
    %48 = arith.addf %43, %47 : vector<1x256xf32>
    %c21 = arith.constant 21 : index
    %49 = memref.load %arg4[%c21] : memref<98xf32, #tpu.memory_space<smem>>
    %c0_23 = arith.constant 0 : index
    %c125 = arith.constant 125 : index
    %50 = vector.load %arg7[%c0_23, %c125] : memref<2x512xf32, #tpu.memory_space<vmem>>, vector<1x256xf32>
    %51 = vector.broadcast %49 : f32 to vector<1x256xf32>
    %52 = arith.mulf %51, %50 : vector<1x256xf32>
    %53 = arith.addf %48, %52 : vector<1x256xf32>
    %c28 = arith.constant 28 : index
    %54 = memref.load %arg4[%c28] : memref<98xf32, #tpu.memory_space<smem>>
    %c0_24 = arith.constant 0 : index
    %c141 = arith.constant 141 : index
    %55 = vector.load %arg7[%c0_24, %c141] : memref<2x512xf32, #tpu.memory_space<vmem>>, vector<1x256xf32>
    %56 = vector.broadcast %54 : f32 to vector<1x256xf32>
    %57 = arith.mulf %56, %55 : vector<1x256xf32>
    %58 = arith.addf %53, %57 : vector<1x256xf32>
    %c35 = arith.constant 35 : index
    %59 = memref.load %arg4[%c35] : memref<98xf32, #tpu.memory_space<smem>>
    %c0_25 = arith.constant 0 : index
    %c157 = arith.constant 157 : index
    %60 = vector.load %arg7[%c0_25, %c157] : memref<2x512xf32, #tpu.memory_space<vmem>>, vector<1x256xf32>
    %61 = vector.broadcast %59 : f32 to vector<1x256xf32>
    %62 = arith.mulf %61, %60 : vector<1x256xf32>
    %63 = arith.addf %58, %62 : vector<1x256xf32>
    %c42 = arith.constant 42 : index
    %64 = memref.load %arg4[%c42] : memref<98xf32, #tpu.memory_space<smem>>
    %c0_26 = arith.constant 0 : index
    %c173 = arith.constant 173 : index
    %65 = vector.load %arg7[%c0_26, %c173] : memref<2x512xf32, #tpu.memory_space<vmem>>, vector<1x256xf32>
    %66 = vector.broadcast %64 : f32 to vector<1x256xf32>
    %67 = arith.mulf %66, %65 : vector<1x256xf32>
    %68 = arith.addf %63, %67 : vector<1x256xf32>
    %c49 = arith.constant 49 : index
    %69 = memref.load %arg4[%c49] : memref<98xf32, #tpu.memory_space<smem>>
    %c1 = arith.constant 1 : index
    %c77_27 = arith.constant 77 : index
    %70 = vector.load %arg7[%c1, %c77_27] : memref<2x512xf32, #tpu.memory_space<vmem>>, vector<1x256xf32>
    %71 = vector.broadcast %69 : f32 to vector<1x256xf32>
    %72 = arith.mulf %71, %70 : vector<1x256xf32>
    %73 = arith.addf %68, %72 : vector<1x256xf32>
    %c56 = arith.constant 56 : index
    %74 = memref.load %arg4[%c56] : memref<98xf32, #tpu.memory_space<smem>>
    %c1_28 = arith.constant 1 : index
    %c93_29 = arith.constant 93 : index
    %75 = vector.load %arg7[%c1_28, %c93_29] : memref<2x512xf32, #tpu.memory_space<vmem>>, vector<1x256xf32>
    %76 = vector.broadcast %74 : f32 to vector<1x256xf32>
    %77 = arith.mulf %76, %75 : vector<1x256xf32>
    %78 = arith.addf %73, %77 : vector<1x256xf32>
    %c63 = arith.constant 63 : index
    %79 = memref.load %arg4[%c63] : memref<98xf32, #tpu.memory_space<smem>>
    %c1_30 = arith.constant 1 : index
    %c109_31 = arith.constant 109 : index
    %80 = vector.load %arg7[%c1_30, %c109_31] : memref<2x512xf32, #tpu.memory_space<vmem>>, vector<1x256xf32>
    %81 = vector.broadcast %79 : f32 to vector<1x256xf32>
    %82 = arith.mulf %81, %80 : vector<1x256xf32>
    %83 = arith.addf %78, %82 : vector<1x256xf32>
    %c70 = arith.constant 70 : index
    %84 = memref.load %arg4[%c70] : memref<98xf32, #tpu.memory_space<smem>>
    %c1_32 = arith.constant 1 : index
    %c125_33 = arith.constant 125 : index
    %85 = vector.load %arg7[%c1_32, %c125_33] : memref<2x512xf32, #tpu.memory_space<vmem>>, vector<1x256xf32>
    %86 = vector.broadcast %84 : f32 to vector<1x256xf32>
    %87 = arith.mulf %86, %85 : vector<1x256xf32>
    %88 = arith.addf %83, %87 : vector<1x256xf32>
    %c77_34 = arith.constant 77 : index
    %89 = memref.load %arg4[%c77_34] : memref<98xf32, #tpu.memory_space<smem>>
    %c1_35 = arith.constant 1 : index
    %c141_36 = arith.constant 141 : index
    %90 = vector.load %arg7[%c1_35, %c141_36] : memref<2x512xf32, #tpu.memory_space<vmem>>, vector<1x256xf32>
    %91 = vector.broadcast %89 : f32 to vector<1x256xf32>
    %92 = arith.mulf %91, %90 : vector<1x256xf32>
    %93 = arith.addf %88, %92 : vector<1x256xf32>
    %c84 = arith.constant 84 : index
    %94 = memref.load %arg4[%c84] : memref<98xf32, #tpu.memory_space<smem>>
    %c1_37 = arith.constant 1 : index
    %c157_38 = arith.constant 157 : index
    %95 = vector.load %arg7[%c1_37, %c157_38] : memref<2x512xf32, #tpu.memory_space<vmem>>, vector<1x256xf32>
    %96 = vector.broadcast %94 : f32 to vector<1x256xf32>
    %97 = arith.mulf %96, %95 : vector<1x256xf32>
    %98 = arith.addf %93, %97 : vector<1x256xf32>
    %c91 = arith.constant 91 : index
    %99 = memref.load %arg4[%c91] : memref<98xf32, #tpu.memory_space<smem>>
    %c1_39 = arith.constant 1 : index
    %c173_40 = arith.constant 173 : index
    %100 = vector.load %arg7[%c1_39, %c173_40] : memref<2x512xf32, #tpu.memory_space<vmem>>, vector<1x256xf32>
    %101 = vector.broadcast %99 : f32 to vector<1x256xf32>
    %102 = arith.mulf %101, %100 : vector<1x256xf32>
    %103 = arith.addf %98, %102 : vector<1x256xf32>
    %c0_41 = arith.constant 0 : index
    %c0_42 = arith.constant 0 : index
    %104 = vector.load %arg5[%c0_41, %c0_42] : memref<7x256xf32, #tpu.memory_space<vmem>>, vector<1x256xf32>
    %105 = arith.mulf %104, %103 : vector<1x256xf32>
    %106 = arith.addf %32, %105 : vector<1x256xf32>
    %cst_43 = arith.constant 0.000000e+00 : f32
    %107 = vector.broadcast %cst_43 : f32 to vector<1x256xf32>
    %c1_44 = arith.constant 1 : index
    %108 = memref.load %arg4[%c1_44] : memref<98xf32, #tpu.memory_space<smem>>
    %c0_45 = arith.constant 0 : index
    %c78 = arith.constant 78 : index
    %109 = vector.load %arg7[%c0_45, %c78] : memref<2x512xf32, #tpu.memory_space<vmem>>, vector<1x256xf32>
    %110 = vector.broadcast %108 : f32 to vector<1x256xf32>
    %111 = arith.mulf %110, %109 : vector<1x256xf32>
    %112 = arith.addf %107, %111 : vector<1x256xf32>
    %c8 = arith.constant 8 : index
    %113 = memref.load %arg4[%c8] : memref<98xf32, #tpu.memory_space<smem>>
    %c0_46 = arith.constant 0 : index
    %c94 = arith.constant 94 : index
    %114 = vector.load %arg7[%c0_46, %c94] : memref<2x512xf32, #tpu.memory_space<vmem>>, vector<1x256xf32>
    %115 = vector.broadcast %113 : f32 to vector<1x256xf32>
    %116 = arith.mulf %115, %114 : vector<1x256xf32>
    %117 = arith.addf %112, %116 : vector<1x256xf32>
    %c15 = arith.constant 15 : index
    %118 = memref.load %arg4[%c15] : memref<98xf32, #tpu.memory_space<smem>>
    %c0_47 = arith.constant 0 : index
    %c110 = arith.constant 110 : index
    %119 = vector.load %arg7[%c0_47, %c110] : memref<2x512xf32, #tpu.memory_space<vmem>>, vector<1x256xf32>
    %120 = vector.broadcast %118 : f32 to vector<1x256xf32>
    %121 = arith.mulf %120, %119 : vector<1x256xf32>
    %122 = arith.addf %117, %121 : vector<1x256xf32>
    %c22 = arith.constant 22 : index
    %123 = memref.load %arg4[%c22] : memref<98xf32, #tpu.memory_space<smem>>
    %c0_48 = arith.constant 0 : index
    %c126 = arith.constant 126 : index
    %124 = vector.load %arg7[%c0_48, %c126] : memref<2x512xf32, #tpu.memory_space<vmem>>, vector<1x256xf32>
    %125 = vector.broadcast %123 : f32 to vector<1x256xf32>
    %126 = arith.mulf %125, %124 : vector<1x256xf32>
    %127 = arith.addf %122, %126 : vector<1x256xf32>
    %c29 = arith.constant 29 : index
    %128 = memref.load %arg4[%c29] : memref<98xf32, #tpu.memory_space<smem>>
    %c0_49 = arith.constant 0 : index
    %c142 = arith.constant 142 : index
    %129 = vector.load %arg7[%c0_49, %c142] : memref<2x512xf32, #tpu.memory_space<vmem>>, vector<1x256xf32>
    %130 = vector.broadcast %128 : f32 to vector<1x256xf32>
    %131 = arith.mulf %130, %129 : vector<1x256xf32>
    %132 = arith.addf %127, %131 : vector<1x256xf32>
    %c36 = arith.constant 36 : index
    %133 = memref.load %arg4[%c36] : memref<98xf32, #tpu.memory_space<smem>>
    %c0_50 = arith.constant 0 : index
    %c158 = arith.constant 158 : index
    %134 = vector.load %arg7[%c0_50, %c158] : memref<2x512xf32, #tpu.memory_space<vmem>>, vector<1x256xf32>
    %135 = vector.broadcast %133 : f32 to vector<1x256xf32>
    %136 = arith.mulf %135, %134 : vector<1x256xf32>
    %137 = arith.addf %132, %136 : vector<1x256xf32>
    %c43 = arith.constant 43 : index
    %138 = memref.load %arg4[%c43] : memref<98xf32, #tpu.memory_space<smem>>
    %c0_51 = arith.constant 0 : index
    %c174 = arith.constant 174 : index
    %139 = vector.load %arg7[%c0_51, %c174] : memref<2x512xf32, #tpu.memory_space<vmem>>, vector<1x256xf32>
    %140 = vector.broadcast %138 : f32 to vector<1x256xf32>
    %141 = arith.mulf %140, %139 : vector<1x256xf32>
    %142 = arith.addf %137, %141 : vector<1x256xf32>
    %c50 = arith.constant 50 : index
    %143 = memref.load %arg4[%c50] : memref<98xf32, #tpu.memory_space<smem>>
    %c1_52 = arith.constant 1 : index
    %c78_53 = arith.constant 78 : index
    %144 = vector.load %arg7[%c1_52, %c78_53] : memref<2x512xf32, #tpu.memory_space<vmem>>, vector<1x256xf32>
    %145 = vector.broadcast %143 : f32 to vector<1x256xf32>
    %146 = arith.mulf %145, %144 : vector<1x256xf32>
    %147 = arith.addf %142, %146 : vector<1x256xf32>
    %c57 = arith.constant 57 : index
    %148 = memref.load %arg4[%c57] : memref<98xf32, #tpu.memory_space<smem>>
    %c1_54 = arith.constant 1 : index
    %c94_55 = arith.constant 94 : index
    %149 = vector.load %arg7[%c1_54, %c94_55] : memref<2x512xf32, #tpu.memory_space<vmem>>, vector<1x256xf32>
    %150 = vector.broadcast %148 : f32 to vector<1x256xf32>
    %151 = arith.mulf %150, %149 : vector<1x256xf32>
    %152 = arith.addf %147, %151 : vector<1x256xf32>
    %c64 = arith.constant 64 : index
    %153 = memref.load %arg4[%c64] : memref<98xf32, #tpu.memory_space<smem>>
    %c1_56 = arith.constant 1 : index
    %c110_57 = arith.constant 110 : index
    %154 = vector.load %arg7[%c1_56, %c110_57] : memref<2x512xf32, #tpu.memory_space<vmem>>, vector<1x256xf32>
    %155 = vector.broadcast %153 : f32 to vector<1x256xf32>
    %156 = arith.mulf %155, %154 : vector<1x256xf32>
    %157 = arith.addf %152, %156 : vector<1x256xf32>
    %c71 = arith.constant 71 : index
    %158 = memref.load %arg4[%c71] : memref<98xf32, #tpu.memory_space<smem>>
    %c1_58 = arith.constant 1 : index
    %c126_59 = arith.constant 126 : index
    %159 = vector.load %arg7[%c1_58, %c126_59] : memref<2x512xf32, #tpu.memory_space<vmem>>, vector<1x256xf32>
    %160 = vector.broadcast %158 : f32 to vector<1x256xf32>
    %161 = arith.mulf %160, %159 : vector<1x256xf32>
    %162 = arith.addf %157, %161 : vector<1x256xf32>
    %c78_60 = arith.constant 78 : index
    %163 = memref.load %arg4[%c78_60] : memref<98xf32, #tpu.memory_space<smem>>
    %c1_61 = arith.constant 1 : index
    %c142_62 = arith.constant 142 : index
    %164 = vector.load %arg7[%c1_61, %c142_62] : memref<2x512xf32, #tpu.memory_space<vmem>>, vector<1x256xf32>
    %165 = vector.broadcast %163 : f32 to vector<1x256xf32>
    %166 = arith.mulf %165, %164 : vector<1x256xf32>
    %167 = arith.addf %162, %166 : vector<1x256xf32>
    %c85 = arith.constant 85 : index
    %168 = memref.load %arg4[%c85] : memref<98xf32, #tpu.memory_space<smem>>
    %c1_63 = arith.constant 1 : index
    %c158_64 = arith.constant 158 : index
    %169 = vector.load %arg7[%c1_63, %c158_64] : memref<2x512xf32, #tpu.memory_space<vmem>>, vector<1x256xf32>
    %170 = vector.broadcast %168 : f32 to vector<1x256xf32>
    %171 = arith.mulf %170, %169 : vector<1x256xf32>
    %172 = arith.addf %167, %171 : vector<1x256xf32>
    %c92 = arith.constant 92 : index
    %173 = memref.load %arg4[%c92] : memref<98xf32, #tpu.memory_space<smem>>
    %c1_65 = arith.constant 1 : index
    %c174_66 = arith.constant 174 : index
    %174 = vector.load %arg7[%c1_65, %c174_66] : memref<2x512xf32, #tpu.memory_space<vmem>>, vector<1x256xf32>
    %175 = vector.broadcast %173 : f32 to vector<1x256xf32>
    %176 = arith.mulf %175, %174 : vector<1x256xf32>
    %177 = arith.addf %172, %176 : vector<1x256xf32>
    %c1_67 = arith.constant 1 : index
    %c0_68 = arith.constant 0 : index
    %178 = vector.load %arg5[%c1_67, %c0_68] : memref<7x256xf32, #tpu.memory_space<vmem>>, vector<1x256xf32>
    %179 = arith.mulf %178, %177 : vector<1x256xf32>
    %180 = arith.addf %106, %179 : vector<1x256xf32>
    %cst_69 = arith.constant 0.000000e+00 : f32
    %181 = vector.broadcast %cst_69 : f32 to vector<1x256xf32>
    %c2 = arith.constant 2 : index
    %182 = memref.load %arg4[%c2] : memref<98xf32, #tpu.memory_space<smem>>
    %c0_70 = arith.constant 0 : index
    %c79 = arith.constant 79 : index
    %183 = vector.load %arg7[%c0_70, %c79] : memref<2x512xf32, #tpu.memory_space<vmem>>, vector<1x256xf32>
    %184 = vector.broadcast %182 : f32 to vector<1x256xf32>
    %185 = arith.mulf %184, %183 : vector<1x256xf32>
    %186 = arith.addf %181, %185 : vector<1x256xf32>
    %c9 = arith.constant 9 : index
    %187 = memref.load %arg4[%c9] : memref<98xf32, #tpu.memory_space<smem>>
    %c0_71 = arith.constant 0 : index
    %c95 = arith.constant 95 : index
    %188 = vector.load %arg7[%c0_71, %c95] : memref<2x512xf32, #tpu.memory_space<vmem>>, vector<1x256xf32>
    %189 = vector.broadcast %187 : f32 to vector<1x256xf32>
    %190 = arith.mulf %189, %188 : vector<1x256xf32>
    %191 = arith.addf %186, %190 : vector<1x256xf32>
    %c16 = arith.constant 16 : index
    %192 = memref.load %arg4[%c16] : memref<98xf32, #tpu.memory_space<smem>>
    %c0_72 = arith.constant 0 : index
    %c111 = arith.constant 111 : index
    %193 = vector.load %arg7[%c0_72, %c111] : memref<2x512xf32, #tpu.memory_space<vmem>>, vector<1x256xf32>
    %194 = vector.broadcast %192 : f32 to vector<1x256xf32>
    %195 = arith.mulf %194, %193 : vector<1x256xf32>
    %196 = arith.addf %191, %195 : vector<1x256xf32>
    %c23 = arith.constant 23 : index
    %197 = memref.load %arg4[%c23] : memref<98xf32, #tpu.memory_space<smem>>
    %c0_73 = arith.constant 0 : index
    %c127 = arith.constant 127 : index
    %198 = vector.load %arg7[%c0_73, %c127] : memref<2x512xf32, #tpu.memory_space<vmem>>, vector<1x256xf32>
    %199 = vector.broadcast %197 : f32 to vector<1x256xf32>
    %200 = arith.mulf %199, %198 : vector<1x256xf32>
    %201 = arith.addf %196, %200 : vector<1x256xf32>
    %c30 = arith.constant 30 : index
    %202 = memref.load %arg4[%c30] : memref<98xf32, #tpu.memory_space<smem>>
    %c0_74 = arith.constant 0 : index
    %c143 = arith.constant 143 : index
    %203 = vector.load %arg7[%c0_74, %c143] : memref<2x512xf32, #tpu.memory_space<vmem>>, vector<1x256xf32>
    %204 = vector.broadcast %202 : f32 to vector<1x256xf32>
    %205 = arith.mulf %204, %203 : vector<1x256xf32>
    %206 = arith.addf %201, %205 : vector<1x256xf32>
    %c37 = arith.constant 37 : index
    %207 = memref.load %arg4[%c37] : memref<98xf32, #tpu.memory_space<smem>>
    %c0_75 = arith.constant 0 : index
    %c159 = arith.constant 159 : index
    %208 = vector.load %arg7[%c0_75, %c159] : memref<2x512xf32, #tpu.memory_space<vmem>>, vector<1x256xf32>
    %209 = vector.broadcast %207 : f32 to vector<1x256xf32>
    %210 = arith.mulf %209, %208 : vector<1x256xf32>
    %211 = arith.addf %206, %210 : vector<1x256xf32>
    %c44 = arith.constant 44 : index
    %212 = memref.load %arg4[%c44] : memref<98xf32, #tpu.memory_space<smem>>
    %c0_76 = arith.constant 0 : index
    %c175 = arith.constant 175 : index
    %213 = vector.load %arg7[%c0_76, %c175] : memref<2x512xf32, #tpu.memory_space<vmem>>, vector<1x256xf32>
    %214 = vector.broadcast %212 : f32 to vector<1x256xf32>
    %215 = arith.mulf %214, %213 : vector<1x256xf32>
    %216 = arith.addf %211, %215 : vector<1x256xf32>
    %c51 = arith.constant 51 : index
    %217 = memref.load %arg4[%c51] : memref<98xf32, #tpu.memory_space<smem>>
    %c1_77 = arith.constant 1 : index
    %c79_78 = arith.constant 79 : index
    %218 = vector.load %arg7[%c1_77, %c79_78] : memref<2x512xf32, #tpu.memory_space<vmem>>, vector<1x256xf32>
    %219 = vector.broadcast %217 : f32 to vector<1x256xf32>
    %220 = arith.mulf %219, %218 : vector<1x256xf32>
    %221 = arith.addf %216, %220 : vector<1x256xf32>
    %c58 = arith.constant 58 : index
    %222 = memref.load %arg4[%c58] : memref<98xf32, #tpu.memory_space<smem>>
    %c1_79 = arith.constant 1 : index
    %c95_80 = arith.constant 95 : index
    %223 = vector.load %arg7[%c1_79, %c95_80] : memref<2x512xf32, #tpu.memory_space<vmem>>, vector<1x256xf32>
    %224 = vector.broadcast %222 : f32 to vector<1x256xf32>
    %225 = arith.mulf %224, %223 : vector<1x256xf32>
    %226 = arith.addf %221, %225 : vector<1x256xf32>
    %c65 = arith.constant 65 : index
    %227 = memref.load %arg4[%c65] : memref<98xf32, #tpu.memory_space<smem>>
    %c1_81 = arith.constant 1 : index
    %c111_82 = arith.constant 111 : index
    %228 = vector.load %arg7[%c1_81, %c111_82] : memref<2x512xf32, #tpu.memory_space<vmem>>, vector<1x256xf32>
    %229 = vector.broadcast %227 : f32 to vector<1x256xf32>
    %230 = arith.mulf %229, %228 : vector<1x256xf32>
    %231 = arith.addf %226, %230 : vector<1x256xf32>
    %c72 = arith.constant 72 : index
    %232 = memref.load %arg4[%c72] : memref<98xf32, #tpu.memory_space<smem>>
    %c1_83 = arith.constant 1 : index
    %c127_84 = arith.constant 127 : index
    %233 = vector.load %arg7[%c1_83, %c127_84] : memref<2x512xf32, #tpu.memory_space<vmem>>, vector<1x256xf32>
    %234 = vector.broadcast %232 : f32 to vector<1x256xf32>
    %235 = arith.mulf %234, %233 : vector<1x256xf32>
    %236 = arith.addf %231, %235 : vector<1x256xf32>
    %c79_85 = arith.constant 79 : index
    %237 = memref.load %arg4[%c79_85] : memref<98xf32, #tpu.memory_space<smem>>
    %c1_86 = arith.constant 1 : index
    %c143_87 = arith.constant 143 : index
    %238 = vector.load %arg7[%c1_86, %c143_87] : memref<2x512xf32, #tpu.memory_space<vmem>>, vector<1x256xf32>
    %239 = vector.broadcast %237 : f32 to vector<1x256xf32>
    %240 = arith.mulf %239, %238 : vector<1x256xf32>
    %241 = arith.addf %236, %240 : vector<1x256xf32>
    %c86 = arith.constant 86 : index
    %242 = memref.load %arg4[%c86] : memref<98xf32, #tpu.memory_space<smem>>
    %c1_88 = arith.constant 1 : index
    %c159_89 = arith.constant 159 : index
    %243 = vector.load %arg7[%c1_88, %c159_89] : memref<2x512xf32, #tpu.memory_space<vmem>>, vector<1x256xf32>
    %244 = vector.broadcast %242 : f32 to vector<1x256xf32>
    %245 = arith.mulf %244, %243 : vector<1x256xf32>
    %246 = arith.addf %241, %245 : vector<1x256xf32>
    %c93_90 = arith.constant 93 : index
    %247 = memref.load %arg4[%c93_90] : memref<98xf32, #tpu.memory_space<smem>>
    %c1_91 = arith.constant 1 : index
    %c175_92 = arith.constant 175 : index
    %248 = vector.load %arg7[%c1_91, %c175_92] : memref<2x512xf32, #tpu.memory_space<vmem>>, vector<1x256xf32>
    %249 = vector.broadcast %247 : f32 to vector<1x256xf32>
    %250 = arith.mulf %249, %248 : vector<1x256xf32>
    %251 = arith.addf %246, %250 : vector<1x256xf32>
    %c2_93 = arith.constant 2 : index
    %c0_94 = arith.constant 0 : index
    %252 = vector.load %arg5[%c2_93, %c0_94] : memref<7x256xf32, #tpu.memory_space<vmem>>, vector<1x256xf32>
    %253 = arith.mulf %252, %251 : vector<1x256xf32>
    %254 = arith.addf %180, %253 : vector<1x256xf32>
    %cst_95 = arith.constant 0.000000e+00 : f32
    %255 = vector.broadcast %cst_95 : f32 to vector<1x256xf32>
    %c3 = arith.constant 3 : index
    %256 = memref.load %arg4[%c3] : memref<98xf32, #tpu.memory_space<smem>>
    %c0_96 = arith.constant 0 : index
    %c80 = arith.constant 80 : index
    %257 = vector.load %arg7[%c0_96, %c80] : memref<2x512xf32, #tpu.memory_space<vmem>>, vector<1x256xf32>
    %258 = vector.broadcast %256 : f32 to vector<1x256xf32>
    %259 = arith.mulf %258, %257 : vector<1x256xf32>
    %260 = arith.addf %255, %259 : vector<1x256xf32>
    %c10 = arith.constant 10 : index
    %261 = memref.load %arg4[%c10] : memref<98xf32, #tpu.memory_space<smem>>
    %c0_97 = arith.constant 0 : index
    %c96 = arith.constant 96 : index
    %262 = vector.load %arg7[%c0_97, %c96] : memref<2x512xf32, #tpu.memory_space<vmem>>, vector<1x256xf32>
    %263 = vector.broadcast %261 : f32 to vector<1x256xf32>
    %264 = arith.mulf %263, %262 : vector<1x256xf32>
    %265 = arith.addf %260, %264 : vector<1x256xf32>
    %c17 = arith.constant 17 : index
    %266 = memref.load %arg4[%c17] : memref<98xf32, #tpu.memory_space<smem>>
    %c0_98 = arith.constant 0 : index
    %c112 = arith.constant 112 : index
    %267 = vector.load %arg7[%c0_98, %c112] : memref<2x512xf32, #tpu.memory_space<vmem>>, vector<1x256xf32>
    %268 = vector.broadcast %266 : f32 to vector<1x256xf32>
    %269 = arith.mulf %268, %267 : vector<1x256xf32>
    %270 = arith.addf %265, %269 : vector<1x256xf32>
    %c24 = arith.constant 24 : index
    %271 = memref.load %arg4[%c24] : memref<98xf32, #tpu.memory_space<smem>>
    %c0_99 = arith.constant 0 : index
    %c128_100 = arith.constant 128 : index
    %272 = vector.load %arg7[%c0_99, %c128_100] : memref<2x512xf32, #tpu.memory_space<vmem>>, vector<1x256xf32>
    %273 = vector.broadcast %271 : f32 to vector<1x256xf32>
    %274 = arith.mulf %273, %272 : vector<1x256xf32>
    %275 = arith.addf %270, %274 : vector<1x256xf32>
    %c31 = arith.constant 31 : index
    %276 = memref.load %arg4[%c31] : memref<98xf32, #tpu.memory_space<smem>>
    %c0_101 = arith.constant 0 : index
    %c144 = arith.constant 144 : index
    %277 = vector.load %arg7[%c0_101, %c144] : memref<2x512xf32, #tpu.memory_space<vmem>>, vector<1x256xf32>
    %278 = vector.broadcast %276 : f32 to vector<1x256xf32>
    %279 = arith.mulf %278, %277 : vector<1x256xf32>
    %280 = arith.addf %275, %279 : vector<1x256xf32>
    %c38 = arith.constant 38 : index
    %281 = memref.load %arg4[%c38] : memref<98xf32, #tpu.memory_space<smem>>
    %c0_102 = arith.constant 0 : index
    %c160 = arith.constant 160 : index
    %282 = vector.load %arg7[%c0_102, %c160] : memref<2x512xf32, #tpu.memory_space<vmem>>, vector<1x256xf32>
    %283 = vector.broadcast %281 : f32 to vector<1x256xf32>
    %284 = arith.mulf %283, %282 : vector<1x256xf32>
    %285 = arith.addf %280, %284 : vector<1x256xf32>
    %c45 = arith.constant 45 : index
    %286 = memref.load %arg4[%c45] : memref<98xf32, #tpu.memory_space<smem>>
    %c0_103 = arith.constant 0 : index
    %c176 = arith.constant 176 : index
    %287 = vector.load %arg7[%c0_103, %c176] : memref<2x512xf32, #tpu.memory_space<vmem>>, vector<1x256xf32>
    %288 = vector.broadcast %286 : f32 to vector<1x256xf32>
    %289 = arith.mulf %288, %287 : vector<1x256xf32>
    %290 = arith.addf %285, %289 : vector<1x256xf32>
    %c52 = arith.constant 52 : index
    %291 = memref.load %arg4[%c52] : memref<98xf32, #tpu.memory_space<smem>>
    %c1_104 = arith.constant 1 : index
    %c80_105 = arith.constant 80 : index
    %292 = vector.load %arg7[%c1_104, %c80_105] : memref<2x512xf32, #tpu.memory_space<vmem>>, vector<1x256xf32>
    %293 = vector.broadcast %291 : f32 to vector<1x256xf32>
    %294 = arith.mulf %293, %292 : vector<1x256xf32>
    %295 = arith.addf %290, %294 : vector<1x256xf32>
    %c59 = arith.constant 59 : index
    %296 = memref.load %arg4[%c59] : memref<98xf32, #tpu.memory_space<smem>>
    %c1_106 = arith.constant 1 : index
    %c96_107 = arith.constant 96 : index
    %297 = vector.load %arg7[%c1_106, %c96_107] : memref<2x512xf32, #tpu.memory_space<vmem>>, vector<1x256xf32>
    %298 = vector.broadcast %296 : f32 to vector<1x256xf32>
    %299 = arith.mulf %298, %297 : vector<1x256xf32>
    %300 = arith.addf %295, %299 : vector<1x256xf32>
    %c66 = arith.constant 66 : index
    %301 = memref.load %arg4[%c66] : memref<98xf32, #tpu.memory_space<smem>>
    %c1_108 = arith.constant 1 : index
    %c112_109 = arith.constant 112 : index
    %302 = vector.load %arg7[%c1_108, %c112_109] : memref<2x512xf32, #tpu.memory_space<vmem>>, vector<1x256xf32>
    %303 = vector.broadcast %301 : f32 to vector<1x256xf32>
    %304 = arith.mulf %303, %302 : vector<1x256xf32>
    %305 = arith.addf %300, %304 : vector<1x256xf32>
    %c73 = arith.constant 73 : index
    %306 = memref.load %arg4[%c73] : memref<98xf32, #tpu.memory_space<smem>>
    %c1_110 = arith.constant 1 : index
    %c128_111 = arith.constant 128 : index
    %307 = vector.load %arg7[%c1_110, %c128_111] : memref<2x512xf32, #tpu.memory_space<vmem>>, vector<1x256xf32>
    %308 = vector.broadcast %306 : f32 to vector<1x256xf32>
    %309 = arith.mulf %308, %307 : vector<1x256xf32>
    %310 = arith.addf %305, %309 : vector<1x256xf32>
    %c80_112 = arith.constant 80 : index
    %311 = memref.load %arg4[%c80_112] : memref<98xf32, #tpu.memory_space<smem>>
    %c1_113 = arith.constant 1 : index
    %c144_114 = arith.constant 144 : index
    %312 = vector.load %arg7[%c1_113, %c144_114] : memref<2x512xf32, #tpu.memory_space<vmem>>, vector<1x256xf32>
    %313 = vector.broadcast %311 : f32 to vector<1x256xf32>
    %314 = arith.mulf %313, %312 : vector<1x256xf32>
    %315 = arith.addf %310, %314 : vector<1x256xf32>
    %c87 = arith.constant 87 : index
    %316 = memref.load %arg4[%c87] : memref<98xf32, #tpu.memory_space<smem>>
    %c1_115 = arith.constant 1 : index
    %c160_116 = arith.constant 160 : index
    %317 = vector.load %arg7[%c1_115, %c160_116] : memref<2x512xf32, #tpu.memory_space<vmem>>, vector<1x256xf32>
    %318 = vector.broadcast %316 : f32 to vector<1x256xf32>
    %319 = arith.mulf %318, %317 : vector<1x256xf32>
    %320 = arith.addf %315, %319 : vector<1x256xf32>
    %c94_117 = arith.constant 94 : index
    %321 = memref.load %arg4[%c94_117] : memref<98xf32, #tpu.memory_space<smem>>
    %c1_118 = arith.constant 1 : index
    %c176_119 = arith.constant 176 : index
    %322 = vector.load %arg7[%c1_118, %c176_119] : memref<2x512xf32, #tpu.memory_space<vmem>>, vector<1x256xf32>
    %323 = vector.broadcast %321 : f32 to vector<1x256xf32>
    %324 = arith.mulf %323, %322 : vector<1x256xf32>
    %325 = arith.addf %320, %324 : vector<1x256xf32>
    %c3_120 = arith.constant 3 : index
    %c0_121 = arith.constant 0 : index
    %326 = vector.load %arg5[%c3_120, %c0_121] : memref<7x256xf32, #tpu.memory_space<vmem>>, vector<1x256xf32>
    %327 = arith.mulf %326, %325 : vector<1x256xf32>
    %328 = arith.addf %254, %327 : vector<1x256xf32>
    %cst_122 = arith.constant 0.000000e+00 : f32
    %329 = vector.broadcast %cst_122 : f32 to vector<1x256xf32>
    %c4 = arith.constant 4 : index
    %330 = memref.load %arg4[%c4] : memref<98xf32, #tpu.memory_space<smem>>
    %c0_123 = arith.constant 0 : index
    %c81 = arith.constant 81 : index
    %331 = vector.load %arg7[%c0_123, %c81] : memref<2x512xf32, #tpu.memory_space<vmem>>, vector<1x256xf32>
    %332 = vector.broadcast %330 : f32 to vector<1x256xf32>
    %333 = arith.mulf %332, %331 : vector<1x256xf32>
    %334 = arith.addf %329, %333 : vector<1x256xf32>
    %c11 = arith.constant 11 : index
    %335 = memref.load %arg4[%c11] : memref<98xf32, #tpu.memory_space<smem>>
    %c0_124 = arith.constant 0 : index
    %c97 = arith.constant 97 : index
    %336 = vector.load %arg7[%c0_124, %c97] : memref<2x512xf32, #tpu.memory_space<vmem>>, vector<1x256xf32>
    %337 = vector.broadcast %335 : f32 to vector<1x256xf32>
    %338 = arith.mulf %337, %336 : vector<1x256xf32>
    %339 = arith.addf %334, %338 : vector<1x256xf32>
    %c18 = arith.constant 18 : index
    %340 = memref.load %arg4[%c18] : memref<98xf32, #tpu.memory_space<smem>>
    %c0_125 = arith.constant 0 : index
    %c113 = arith.constant 113 : index
    %341 = vector.load %arg7[%c0_125, %c113] : memref<2x512xf32, #tpu.memory_space<vmem>>, vector<1x256xf32>
    %342 = vector.broadcast %340 : f32 to vector<1x256xf32>
    %343 = arith.mulf %342, %341 : vector<1x256xf32>
    %344 = arith.addf %339, %343 : vector<1x256xf32>
    %c25 = arith.constant 25 : index
    %345 = memref.load %arg4[%c25] : memref<98xf32, #tpu.memory_space<smem>>
    %c0_126 = arith.constant 0 : index
    %c129 = arith.constant 129 : index
    %346 = vector.load %arg7[%c0_126, %c129] : memref<2x512xf32, #tpu.memory_space<vmem>>, vector<1x256xf32>
    %347 = vector.broadcast %345 : f32 to vector<1x256xf32>
    %348 = arith.mulf %347, %346 : vector<1x256xf32>
    %349 = arith.addf %344, %348 : vector<1x256xf32>
    %c32 = arith.constant 32 : index
    %350 = memref.load %arg4[%c32] : memref<98xf32, #tpu.memory_space<smem>>
    %c0_127 = arith.constant 0 : index
    %c145 = arith.constant 145 : index
    %351 = vector.load %arg7[%c0_127, %c145] : memref<2x512xf32, #tpu.memory_space<vmem>>, vector<1x256xf32>
    %352 = vector.broadcast %350 : f32 to vector<1x256xf32>
    %353 = arith.mulf %352, %351 : vector<1x256xf32>
    %354 = arith.addf %349, %353 : vector<1x256xf32>
    %c39 = arith.constant 39 : index
    %355 = memref.load %arg4[%c39] : memref<98xf32, #tpu.memory_space<smem>>
    %c0_128 = arith.constant 0 : index
    %c161 = arith.constant 161 : index
    %356 = vector.load %arg7[%c0_128, %c161] : memref<2x512xf32, #tpu.memory_space<vmem>>, vector<1x256xf32>
    %357 = vector.broadcast %355 : f32 to vector<1x256xf32>
    %358 = arith.mulf %357, %356 : vector<1x256xf32>
    %359 = arith.addf %354, %358 : vector<1x256xf32>
    %c46 = arith.constant 46 : index
    %360 = memref.load %arg4[%c46] : memref<98xf32, #tpu.memory_space<smem>>
    %c0_129 = arith.constant 0 : index
    %c177 = arith.constant 177 : index
    %361 = vector.load %arg7[%c0_129, %c177] : memref<2x512xf32, #tpu.memory_space<vmem>>, vector<1x256xf32>
    %362 = vector.broadcast %360 : f32 to vector<1x256xf32>
    %363 = arith.mulf %362, %361 : vector<1x256xf32>
    %364 = arith.addf %359, %363 : vector<1x256xf32>
    %c53 = arith.constant 53 : index
    %365 = memref.load %arg4[%c53] : memref<98xf32, #tpu.memory_space<smem>>
    %c1_130 = arith.constant 1 : index
    %c81_131 = arith.constant 81 : index
    %366 = vector.load %arg7[%c1_130, %c81_131] : memref<2x512xf32, #tpu.memory_space<vmem>>, vector<1x256xf32>
    %367 = vector.broadcast %365 : f32 to vector<1x256xf32>
    %368 = arith.mulf %367, %366 : vector<1x256xf32>
    %369 = arith.addf %364, %368 : vector<1x256xf32>
    %c60 = arith.constant 60 : index
    %370 = memref.load %arg4[%c60] : memref<98xf32, #tpu.memory_space<smem>>
    %c1_132 = arith.constant 1 : index
    %c97_133 = arith.constant 97 : index
    %371 = vector.load %arg7[%c1_132, %c97_133] : memref<2x512xf32, #tpu.memory_space<vmem>>, vector<1x256xf32>
    %372 = vector.broadcast %370 : f32 to vector<1x256xf32>
    %373 = arith.mulf %372, %371 : vector<1x256xf32>
    %374 = arith.addf %369, %373 : vector<1x256xf32>
    %c67 = arith.constant 67 : index
    %375 = memref.load %arg4[%c67] : memref<98xf32, #tpu.memory_space<smem>>
    %c1_134 = arith.constant 1 : index
    %c113_135 = arith.constant 113 : index
    %376 = vector.load %arg7[%c1_134, %c113_135] : memref<2x512xf32, #tpu.memory_space<vmem>>, vector<1x256xf32>
    %377 = vector.broadcast %375 : f32 to vector<1x256xf32>
    %378 = arith.mulf %377, %376 : vector<1x256xf32>
    %379 = arith.addf %374, %378 : vector<1x256xf32>
    %c74 = arith.constant 74 : index
    %380 = memref.load %arg4[%c74] : memref<98xf32, #tpu.memory_space<smem>>
    %c1_136 = arith.constant 1 : index
    %c129_137 = arith.constant 129 : index
    %381 = vector.load %arg7[%c1_136, %c129_137] : memref<2x512xf32, #tpu.memory_space<vmem>>, vector<1x256xf32>
    %382 = vector.broadcast %380 : f32 to vector<1x256xf32>
    %383 = arith.mulf %382, %381 : vector<1x256xf32>
    %384 = arith.addf %379, %383 : vector<1x256xf32>
    %c81_138 = arith.constant 81 : index
    %385 = memref.load %arg4[%c81_138] : memref<98xf32, #tpu.memory_space<smem>>
    %c1_139 = arith.constant 1 : index
    %c145_140 = arith.constant 145 : index
    %386 = vector.load %arg7[%c1_139, %c145_140] : memref<2x512xf32, #tpu.memory_space<vmem>>, vector<1x256xf32>
    %387 = vector.broadcast %385 : f32 to vector<1x256xf32>
    %388 = arith.mulf %387, %386 : vector<1x256xf32>
    %389 = arith.addf %384, %388 : vector<1x256xf32>
    %c88 = arith.constant 88 : index
    %390 = memref.load %arg4[%c88] : memref<98xf32, #tpu.memory_space<smem>>
    %c1_141 = arith.constant 1 : index
    %c161_142 = arith.constant 161 : index
    %391 = vector.load %arg7[%c1_141, %c161_142] : memref<2x512xf32, #tpu.memory_space<vmem>>, vector<1x256xf32>
    %392 = vector.broadcast %390 : f32 to vector<1x256xf32>
    %393 = arith.mulf %392, %391 : vector<1x256xf32>
    %394 = arith.addf %389, %393 : vector<1x256xf32>
    %c95_143 = arith.constant 95 : index
    %395 = memref.load %arg4[%c95_143] : memref<98xf32, #tpu.memory_space<smem>>
    %c1_144 = arith.constant 1 : index
    %c177_145 = arith.constant 177 : index
    %396 = vector.load %arg7[%c1_144, %c177_145] : memref<2x512xf32, #tpu.memory_space<vmem>>, vector<1x256xf32>
    %397 = vector.broadcast %395 : f32 to vector<1x256xf32>
    %398 = arith.mulf %397, %396 : vector<1x256xf32>
    %399 = arith.addf %394, %398 : vector<1x256xf32>
    %c4_146 = arith.constant 4 : index
    %c0_147 = arith.constant 0 : index
    %400 = vector.load %arg5[%c4_146, %c0_147] : memref<7x256xf32, #tpu.memory_space<vmem>>, vector<1x256xf32>
    %401 = arith.mulf %400, %399 : vector<1x256xf32>
    %402 = arith.addf %328, %401 : vector<1x256xf32>
    %cst_148 = arith.constant 0.000000e+00 : f32
    %403 = vector.broadcast %cst_148 : f32 to vector<1x256xf32>
    %c5 = arith.constant 5 : index
    %404 = memref.load %arg4[%c5] : memref<98xf32, #tpu.memory_space<smem>>
    %c0_149 = arith.constant 0 : index
    %c82 = arith.constant 82 : index
    %405 = vector.load %arg7[%c0_149, %c82] : memref<2x512xf32, #tpu.memory_space<vmem>>, vector<1x256xf32>
    %406 = vector.broadcast %404 : f32 to vector<1x256xf32>
    %407 = arith.mulf %406, %405 : vector<1x256xf32>
    %408 = arith.addf %403, %407 : vector<1x256xf32>
    %c12 = arith.constant 12 : index
    %409 = memref.load %arg4[%c12] : memref<98xf32, #tpu.memory_space<smem>>
    %c0_150 = arith.constant 0 : index
    %c98 = arith.constant 98 : index
    %410 = vector.load %arg7[%c0_150, %c98] : memref<2x512xf32, #tpu.memory_space<vmem>>, vector<1x256xf32>
    %411 = vector.broadcast %409 : f32 to vector<1x256xf32>
    %412 = arith.mulf %411, %410 : vector<1x256xf32>
    %413 = arith.addf %408, %412 : vector<1x256xf32>
    %c19 = arith.constant 19 : index
    %414 = memref.load %arg4[%c19] : memref<98xf32, #tpu.memory_space<smem>>
    %c0_151 = arith.constant 0 : index
    %c114 = arith.constant 114 : index
    %415 = vector.load %arg7[%c0_151, %c114] : memref<2x512xf32, #tpu.memory_space<vmem>>, vector<1x256xf32>
    %416 = vector.broadcast %414 : f32 to vector<1x256xf32>
    %417 = arith.mulf %416, %415 : vector<1x256xf32>
    %418 = arith.addf %413, %417 : vector<1x256xf32>
    %c26 = arith.constant 26 : index
    %419 = memref.load %arg4[%c26] : memref<98xf32, #tpu.memory_space<smem>>
    %c0_152 = arith.constant 0 : index
    %c130 = arith.constant 130 : index
    %420 = vector.load %arg7[%c0_152, %c130] : memref<2x512xf32, #tpu.memory_space<vmem>>, vector<1x256xf32>
    %421 = vector.broadcast %419 : f32 to vector<1x256xf32>
    %422 = arith.mulf %421, %420 : vector<1x256xf32>
    %423 = arith.addf %418, %422 : vector<1x256xf32>
    %c33 = arith.constant 33 : index
    %424 = memref.load %arg4[%c33] : memref<98xf32, #tpu.memory_space<smem>>
    %c0_153 = arith.constant 0 : index
    %c146 = arith.constant 146 : index
    %425 = vector.load %arg7[%c0_153, %c146] : memref<2x512xf32, #tpu.memory_space<vmem>>, vector<1x256xf32>
    %426 = vector.broadcast %424 : f32 to vector<1x256xf32>
    %427 = arith.mulf %426, %425 : vector<1x256xf32>
    %428 = arith.addf %423, %427 : vector<1x256xf32>
    %c40 = arith.constant 40 : index
    %429 = memref.load %arg4[%c40] : memref<98xf32, #tpu.memory_space<smem>>
    %c0_154 = arith.constant 0 : index
    %c162 = arith.constant 162 : index
    %430 = vector.load %arg7[%c0_154, %c162] : memref<2x512xf32, #tpu.memory_space<vmem>>, vector<1x256xf32>
    %431 = vector.broadcast %429 : f32 to vector<1x256xf32>
    %432 = arith.mulf %431, %430 : vector<1x256xf32>
    %433 = arith.addf %428, %432 : vector<1x256xf32>
    %c47 = arith.constant 47 : index
    %434 = memref.load %arg4[%c47] : memref<98xf32, #tpu.memory_space<smem>>
    %c0_155 = arith.constant 0 : index
    %c178 = arith.constant 178 : index
    %435 = vector.load %arg7[%c0_155, %c178] : memref<2x512xf32, #tpu.memory_space<vmem>>, vector<1x256xf32>
    %436 = vector.broadcast %434 : f32 to vector<1x256xf32>
    %437 = arith.mulf %436, %435 : vector<1x256xf32>
    %438 = arith.addf %433, %437 : vector<1x256xf32>
    %c54 = arith.constant 54 : index
    %439 = memref.load %arg4[%c54] : memref<98xf32, #tpu.memory_space<smem>>
    %c1_156 = arith.constant 1 : index
    %c82_157 = arith.constant 82 : index
    %440 = vector.load %arg7[%c1_156, %c82_157] : memref<2x512xf32, #tpu.memory_space<vmem>>, vector<1x256xf32>
    %441 = vector.broadcast %439 : f32 to vector<1x256xf32>
    %442 = arith.mulf %441, %440 : vector<1x256xf32>
    %443 = arith.addf %438, %442 : vector<1x256xf32>
    %c61 = arith.constant 61 : index
    %444 = memref.load %arg4[%c61] : memref<98xf32, #tpu.memory_space<smem>>
    %c1_158 = arith.constant 1 : index
    %c98_159 = arith.constant 98 : index
    %445 = vector.load %arg7[%c1_158, %c98_159] : memref<2x512xf32, #tpu.memory_space<vmem>>, vector<1x256xf32>
    %446 = vector.broadcast %444 : f32 to vector<1x256xf32>
    %447 = arith.mulf %446, %445 : vector<1x256xf32>
    %448 = arith.addf %443, %447 : vector<1x256xf32>
    %c68 = arith.constant 68 : index
    %449 = memref.load %arg4[%c68] : memref<98xf32, #tpu.memory_space<smem>>
    %c1_160 = arith.constant 1 : index
    %c114_161 = arith.constant 114 : index
    %450 = vector.load %arg7[%c1_160, %c114_161] : memref<2x512xf32, #tpu.memory_space<vmem>>, vector<1x256xf32>
    %451 = vector.broadcast %449 : f32 to vector<1x256xf32>
    %452 = arith.mulf %451, %450 : vector<1x256xf32>
    %453 = arith.addf %448, %452 : vector<1x256xf32>
    %c75 = arith.constant 75 : index
    %454 = memref.load %arg4[%c75] : memref<98xf32, #tpu.memory_space<smem>>
    %c1_162 = arith.constant 1 : index
    %c130_163 = arith.constant 130 : index
    %455 = vector.load %arg7[%c1_162, %c130_163] : memref<2x512xf32, #tpu.memory_space<vmem>>, vector<1x256xf32>
    %456 = vector.broadcast %454 : f32 to vector<1x256xf32>
    %457 = arith.mulf %456, %455 : vector<1x256xf32>
    %458 = arith.addf %453, %457 : vector<1x256xf32>
    %c82_164 = arith.constant 82 : index
    %459 = memref.load %arg4[%c82_164] : memref<98xf32, #tpu.memory_space<smem>>
    %c1_165 = arith.constant 1 : index
    %c146_166 = arith.constant 146 : index
    %460 = vector.load %arg7[%c1_165, %c146_166] : memref<2x512xf32, #tpu.memory_space<vmem>>, vector<1x256xf32>
    %461 = vector.broadcast %459 : f32 to vector<1x256xf32>
    %462 = arith.mulf %461, %460 : vector<1x256xf32>
    %463 = arith.addf %458, %462 : vector<1x256xf32>
    %c89 = arith.constant 89 : index
    %464 = memref.load %arg4[%c89] : memref<98xf32, #tpu.memory_space<smem>>
    %c1_167 = arith.constant 1 : index
    %c162_168 = arith.constant 162 : index
    %465 = vector.load %arg7[%c1_167, %c162_168] : memref<2x512xf32, #tpu.memory_space<vmem>>, vector<1x256xf32>
    %466 = vector.broadcast %464 : f32 to vector<1x256xf32>
    %467 = arith.mulf %466, %465 : vector<1x256xf32>
    %468 = arith.addf %463, %467 : vector<1x256xf32>
    %c96_169 = arith.constant 96 : index
    %469 = memref.load %arg4[%c96_169] : memref<98xf32, #tpu.memory_space<smem>>
    %c1_170 = arith.constant 1 : index
    %c178_171 = arith.constant 178 : index
    %470 = vector.load %arg7[%c1_170, %c178_171] : memref<2x512xf32, #tpu.memory_space<vmem>>, vector<1x256xf32>
    %471 = vector.broadcast %469 : f32 to vector<1x256xf32>
    %472 = arith.mulf %471, %470 : vector<1x256xf32>
    %473 = arith.addf %468, %472 : vector<1x256xf32>
    %c5_172 = arith.constant 5 : index
    %c0_173 = arith.constant 0 : index
    %474 = vector.load %arg5[%c5_172, %c0_173] : memref<7x256xf32, #tpu.memory_space<vmem>>, vector<1x256xf32>
    %475 = arith.mulf %474, %473 : vector<1x256xf32>
    %476 = arith.addf %402, %475 : vector<1x256xf32>
    %cst_174 = arith.constant 0.000000e+00 : f32
    %477 = vector.broadcast %cst_174 : f32 to vector<1x256xf32>
    %c6 = arith.constant 6 : index
    %478 = memref.load %arg4[%c6] : memref<98xf32, #tpu.memory_space<smem>>
    %c0_175 = arith.constant 0 : index
    %c83 = arith.constant 83 : index
    %479 = vector.load %arg7[%c0_175, %c83] : memref<2x512xf32, #tpu.memory_space<vmem>>, vector<1x256xf32>
    %480 = vector.broadcast %478 : f32 to vector<1x256xf32>
    %481 = arith.mulf %480, %479 : vector<1x256xf32>
    %482 = arith.addf %477, %481 : vector<1x256xf32>
    %c13 = arith.constant 13 : index
    %483 = memref.load %arg4[%c13] : memref<98xf32, #tpu.memory_space<smem>>
    %c0_176 = arith.constant 0 : index
    %c99 = arith.constant 99 : index
    %484 = vector.load %arg7[%c0_176, %c99] : memref<2x512xf32, #tpu.memory_space<vmem>>, vector<1x256xf32>
    %485 = vector.broadcast %483 : f32 to vector<1x256xf32>
    %486 = arith.mulf %485, %484 : vector<1x256xf32>
    %487 = arith.addf %482, %486 : vector<1x256xf32>
    %c20 = arith.constant 20 : index
    %488 = memref.load %arg4[%c20] : memref<98xf32, #tpu.memory_space<smem>>
    %c0_177 = arith.constant 0 : index
    %c115 = arith.constant 115 : index
    %489 = vector.load %arg7[%c0_177, %c115] : memref<2x512xf32, #tpu.memory_space<vmem>>, vector<1x256xf32>
    %490 = vector.broadcast %488 : f32 to vector<1x256xf32>
    %491 = arith.mulf %490, %489 : vector<1x256xf32>
    %492 = arith.addf %487, %491 : vector<1x256xf32>
    %c27 = arith.constant 27 : index
    %493 = memref.load %arg4[%c27] : memref<98xf32, #tpu.memory_space<smem>>
    %c0_178 = arith.constant 0 : index
    %c131 = arith.constant 131 : index
    %494 = vector.load %arg7[%c0_178, %c131] : memref<2x512xf32, #tpu.memory_space<vmem>>, vector<1x256xf32>
    %495 = vector.broadcast %493 : f32 to vector<1x256xf32>
    %496 = arith.mulf %495, %494 : vector<1x256xf32>
    %497 = arith.addf %492, %496 : vector<1x256xf32>
    %c34 = arith.constant 34 : index
    %498 = memref.load %arg4[%c34] : memref<98xf32, #tpu.memory_space<smem>>
    %c0_179 = arith.constant 0 : index
    %c147 = arith.constant 147 : index
    %499 = vector.load %arg7[%c0_179, %c147] : memref<2x512xf32, #tpu.memory_space<vmem>>, vector<1x256xf32>
    %500 = vector.broadcast %498 : f32 to vector<1x256xf32>
    %501 = arith.mulf %500, %499 : vector<1x256xf32>
    %502 = arith.addf %497, %501 : vector<1x256xf32>
    %c41 = arith.constant 41 : index
    %503 = memref.load %arg4[%c41] : memref<98xf32, #tpu.memory_space<smem>>
    %c0_180 = arith.constant 0 : index
    %c163 = arith.constant 163 : index
    %504 = vector.load %arg7[%c0_180, %c163] : memref<2x512xf32, #tpu.memory_space<vmem>>, vector<1x256xf32>
    %505 = vector.broadcast %503 : f32 to vector<1x256xf32>
    %506 = arith.mulf %505, %504 : vector<1x256xf32>
    %507 = arith.addf %502, %506 : vector<1x256xf32>
    %c48 = arith.constant 48 : index
    %508 = memref.load %arg4[%c48] : memref<98xf32, #tpu.memory_space<smem>>
    %c0_181 = arith.constant 0 : index
    %c179 = arith.constant 179 : index
    %509 = vector.load %arg7[%c0_181, %c179] : memref<2x512xf32, #tpu.memory_space<vmem>>, vector<1x256xf32>
    %510 = vector.broadcast %508 : f32 to vector<1x256xf32>
    %511 = arith.mulf %510, %509 : vector<1x256xf32>
    %512 = arith.addf %507, %511 : vector<1x256xf32>
    %c55 = arith.constant 55 : index
    %513 = memref.load %arg4[%c55] : memref<98xf32, #tpu.memory_space<smem>>
    %c1_182 = arith.constant 1 : index
    %c83_183 = arith.constant 83 : index
    %514 = vector.load %arg7[%c1_182, %c83_183] : memref<2x512xf32, #tpu.memory_space<vmem>>, vector<1x256xf32>
    %515 = vector.broadcast %513 : f32 to vector<1x256xf32>
    %516 = arith.mulf %515, %514 : vector<1x256xf32>
    %517 = arith.addf %512, %516 : vector<1x256xf32>
    %c62 = arith.constant 62 : index
    %518 = memref.load %arg4[%c62] : memref<98xf32, #tpu.memory_space<smem>>
    %c1_184 = arith.constant 1 : index
    %c99_185 = arith.constant 99 : index
    %519 = vector.load %arg7[%c1_184, %c99_185] : memref<2x512xf32, #tpu.memory_space<vmem>>, vector<1x256xf32>
    %520 = vector.broadcast %518 : f32 to vector<1x256xf32>
    %521 = arith.mulf %520, %519 : vector<1x256xf32>
    %522 = arith.addf %517, %521 : vector<1x256xf32>
    %c69 = arith.constant 69 : index
    %523 = memref.load %arg4[%c69] : memref<98xf32, #tpu.memory_space<smem>>
    %c1_186 = arith.constant 1 : index
    %c115_187 = arith.constant 115 : index
    %524 = vector.load %arg7[%c1_186, %c115_187] : memref<2x512xf32, #tpu.memory_space<vmem>>, vector<1x256xf32>
    %525 = vector.broadcast %523 : f32 to vector<1x256xf32>
    %526 = arith.mulf %525, %524 : vector<1x256xf32>
    %527 = arith.addf %522, %526 : vector<1x256xf32>
    %c76 = arith.constant 76 : index
    %528 = memref.load %arg4[%c76] : memref<98xf32, #tpu.memory_space<smem>>
    %c1_188 = arith.constant 1 : index
    %c131_189 = arith.constant 131 : index
    %529 = vector.load %arg7[%c1_188, %c131_189] : memref<2x512xf32, #tpu.memory_space<vmem>>, vector<1x256xf32>
    %530 = vector.broadcast %528 : f32 to vector<1x256xf32>
    %531 = arith.mulf %530, %529 : vector<1x256xf32>
    %532 = arith.addf %527, %531 : vector<1x256xf32>
    %c83_190 = arith.constant 83 : index
    %533 = memref.load %arg4[%c83_190] : memref<98xf32, #tpu.memory_space<smem>>
    %c1_191 = arith.constant 1 : index
    %c147_192 = arith.constant 147 : index
    %534 = vector.load %arg7[%c1_191, %c147_192] : memref<2x512xf32, #tpu.memory_space<vmem>>, vector<1x256xf32>
    %535 = vector.broadcast %533 : f32 to vector<1x256xf32>
    %536 = arith.mulf %535, %534 : vector<1x256xf32>
    %537 = arith.addf %532, %536 : vector<1x256xf32>
    %c90 = arith.constant 90 : index
    %538 = memref.load %arg4[%c90] : memref<98xf32, #tpu.memory_space<smem>>
    %c1_193 = arith.constant 1 : index
    %c163_194 = arith.constant 163 : index
    %539 = vector.load %arg7[%c1_193, %c163_194] : memref<2x512xf32, #tpu.memory_space<vmem>>, vector<1x256xf32>
    %540 = vector.broadcast %538 : f32 to vector<1x256xf32>
    %541 = arith.mulf %540, %539 : vector<1x256xf32>
    %542 = arith.addf %537, %541 : vector<1x256xf32>
    %c97_195 = arith.constant 97 : index
    %543 = memref.load %arg4[%c97_195] : memref<98xf32, #tpu.memory_space<smem>>
    %c1_196 = arith.constant 1 : index
    %c179_197 = arith.constant 179 : index
    %544 = vector.load %arg7[%c1_196, %c179_197] : memref<2x512xf32, #tpu.memory_space<vmem>>, vector<1x256xf32>
    %545 = vector.broadcast %543 : f32 to vector<1x256xf32>
    %546 = arith.mulf %545, %544 : vector<1x256xf32>
    %547 = arith.addf %542, %546 : vector<1x256xf32>
    %c6_198 = arith.constant 6 : index
    %c0_199 = arith.constant 0 : index
    %548 = vector.load %arg5[%c6_198, %c0_199] : memref<7x256xf32, #tpu.memory_space<vmem>>, vector<1x256xf32>
    %549 = arith.mulf %548, %547 : vector<1x256xf32>
    %550 = arith.addf %476, %549 : vector<1x256xf32>
    %551 = arith.negf %550 : vector<1x256xf32>
    %552 = math.exp %551 : vector<1x256xf32>
    %cst_200 = arith.constant 1.000000e+00 : f32
    %553 = vector.broadcast %cst_200 : f32 to vector<1x256xf32>
    %554 = arith.addf %553, %552 : vector<1x256xf32>
    %555 = arith.divf %553, %554 : vector<1x256xf32>
    %556 = vector.broadcast %555 : vector<1x256xf32> to vector<32x256xf32>
    %557 = arith.mulf %25, %556 : vector<32x256xf32>
    %c0_201 = arith.constant 0 : index
    %c0_202 = arith.constant 0 : index
    %c0_203 = arith.constant 0 : index
    %558 = vector.load %arg6[%c0_201, %c0_202, %c0_203] : memref<1x32x256xf32, #tpu.memory_space<vmem>>, vector<1x32x256xf32>
    %559 = vector.shape_cast %558 : vector<1x32x256xf32> to vector<32x256xf32>
    %560 = vector.shape_cast %557 : vector<32x256xf32> to vector<1x32x256xf32>
    tpu.vector_store %arg6[%c0_201, %c0_202, %c0_203], %560 {strides = array<i32>} : memref<1x32x256xf32, #tpu.memory_space<vmem>>, vector<1x32x256xf32>,
    return
  }
  func.func @transform_0(%arg0: i32) -> (i32, i32, i32) {
    %c0_i32 = arith.constant 0 : i32
    %c0_i32_0 = arith.constant 0 : i32
    %c0_i32_1 = arith.constant 0 : i32
    return %arg0, %c0_i32, %c0_i32_0 : i32, i32, i32
  }
  func.func @transform_1(%arg0: i32) -> (i32, i32) {
    %c0_i32 = arith.constant 0 : i32
    %c0_i32_0 = arith.constant 0 : i32
    %c0_i32_1 = arith.constant 0 : i32
    return %c0_i32, %c0_i32_0 : i32, i32
  }
  func.func @transform_2(%arg0: i32) -> (i32, i32) {
    %c0_i32 = arith.constant 0 : i32
    %c0_i32_0 = arith.constant 0 : i32
    %c0_i32_1 = arith.constant 0 : i32
    return %c0_i32, %c0_i32_0 : i32, i32
  }
  func.func @transform_3(%arg0: i32) -> i32 {
    %c0_i32 = arith.constant 0 : i32
    %c0_i32_0 = arith.constant 0 : i32
    return %c0_i32 : i32
  }
  func.func @transform_4(%arg0: i32) -> (i32, i32) {
    %c0_i32 = arith.constant 0 : i32
    %c0_i32_0 = arith.constant 0 : i32
    %c0_i32_1 = arith.constant 0 : i32
    return %c0_i32, %c0_i32_0 : i32, i32
  }
  func.func @transform_5(%arg0: i32) -> (i32, i32, i32) {
    %c0_i32 = arith.constant 0 : i32
    %c0_i32_0 = arith.constant 0 : i32
    %c0_i32_1 = arith.constant 0 : i32
    return %arg0, %c0_i32, %c0_i32_0 : i32, i32, i32
  }
}

</mosaic_0001>

<bundles_post_ra>
// kernel: tpu_custom_call.1
= control target key start
LH: loop header
LB: loop body
LE: loop exit
PB: predicated region body
PF: predicated region fallthrough
CT: control target
= control target key end

     0   :  { %s2889_s0 = inlined_call_operand.hbm [shape: f32[2,32,256], index: 0, kind: input, shape index: {}]   ;;  %s2890_s1 = inlined_call_operand.vmem [shape: f32[2,32], index: 1, kind: input, shape index: {}]   ;;  %s2891_s2 = inlined_call_operand.vmem [shape: f32[32,2], index: 2, kind: input, shape index: {}]   ;;  %s2892_s3 = inlined_call_operand.vmem [shape: f32[98], index: 3, kind: input, shape index: {}]   ;;  %s2893_s4 = inlined_call_operand.vmem [shape: f32[7,256], index: 4, kind: input, shape index: {}]   ;;  %s2894_s5 = inlined_call_operand.hbm [shape: f32[2,32,256], index: 5, kind: output, shape index: {}]  }
   0x1   :  { %2895 = sst [smem:[#allocation13_spill]] %s2892_s3 }
   0x2   :  { %10 = vsyncpa [#allocation4], 0 }
   0x3   :  { %12 = vsyncpa [#allocation4 + $0x1], 0 }
   0x4   :  { %13 = vsyncpa [#allocation6], 0 }
   0x5   :  { %14 = vsyncpa [#allocation5], 0 }
   0x6   :  { %16 = vsyncpa [#allocation5 + $0x1], 0  ;;  %s2152_s18 = smov 0   ;;  %s2154_s19 = smov 0  }
   0x7   :  { %s2156_s20 = smov 0   ;;  %s2158_s21 = smov 0  }
   0x8 LB: > { %s2173_s22 = sadd.s32 4294967295, %s2098_s21   ;;  %s1745_s23 = sadd.s32 4294967294, %s2098_s21   ;;  %s2098_s21 = sphi %s2158_s21, %s2910_s21   ;;  %s2094_s20 = sphi %s2156_s20, %s2909_s20   ;;  %s2090_s19 = sphi %s2154_s19, %s2908_s19   ;;  %s2086_s18 = sphi %s2152_s18, %s2907_s18  }
   0x9   : > { %s2177_s24 = sadd.s32 1, %s2098_s21   ;;  %s29_s25 = sadd.s32 1, %s2094_s20 }
   0xa   : > { %s26_s26 = ssub.s32 %s2098_s21, %s2177_s24  ;;  %p36_p0 = scmp.ne.s32.totalorder %s2094_s20, %s2090_s19 }
   0xb   : > { %p27_p1 = scmp.eq.s32.totalorder %s26_s26, 0  ;;  %p37_p2 = scmp.eq.s32.totalorder %s2098_s21, 0 }
   0xc   : > { %p42_p3 = scmp.ne.s32.totalorder %s2090_s19, %s2086_s18  ;;  %p43_p4 = scmp.eq.s32.totalorder %s2173_s22, 0 }
   0xd   : > { %s2189_s27 = scalar_select %p27_p1, %s2094_s20, %s29_s25  }
   0xe   : > { %p2191_p5 = por %p37_p2, %p36_p0  ;;  %p2197_p6 = por %p43_p4, %p42_p3 }
   0xf   : > { %2896 = sst [smem:[#allocation12_spill]] %s2189_s27  ;;  %p150_p7 = scmp.eq.s32.totalorder %s2173_s22, 1 }
  0x10   : > { %p156_p8 = scmp.eq.s32.totalorder %s1745_s23, 1  ;;  %p1746_p9 = scmp.ge.s32.totalorder %s2098_s21, 1 }
  0x11   : > { %p163_p10 = scmp.lt.s32.totalorder %s2098_s21, 3  ;;  %p2204_p11 = por %p150_p7, %p36_p0 }
  0x12   : > { %p2208_p12 = por %p156_p8, %p42_p3  ;;  %s2902_s3 = sld [smem:[#allocation13_spill]] }
  0x13   : > { %p2212_p13 = pnand %p1746_p9, %p163_p10  ;;  %p1901_p7 = scmp.lt.s32.totalorder %s2098_s21, 2 }
  0x14   : > { %s195_s11 = sand.u32 1, %s2094_s20   ;;  %s2100_s14 = smov [#allocation7]  }
  0x15   : > { %p1888_p2 = pneg %p2212_p13  ;;  %p2229_p8 = pnand %p1901_p7, %p2191_p5 }
  0x16   : > { %s1749_s13 = sshll.u32 %s195_s11, 6  ;;  %s1878_s15 = sshll.u32 %s2098_s21, 6 }
  0x17   : > { %p1889_p3 = pnand %p1888_p2, %p43_p4  ;;  %s199_s16 = scalar_lea.vmem [#allocation3], %s1749_s13 }
  0x18   : > { %s181_s10 = sshll.u32 %s2902_s3, 4  ;;  %s207_s17 = sshll.u32 %s199_s16, 4  ;;  %s182_s10 = int_to_ptr.vmem [resolvable:$true] %s181_s10  ;;  %s208_s17 = int_to_ptr.vmem [resolvable:$true] %s207_s17 }
  0x19   : > { %1891 = dma.vmem_to_smem (!%p1889_p3), %s182_s10, 16, %s2100_s14, [#allocation6]  }
  0x1a   : > { %s204_s26 = scalar_lea.hbm %s2889_s0, %s1878_s15  ;;  %s196_s9 = scalar_lea.sflag [#allocation4], %s195_s11 }
  0x1b   : > { %s205_s8 = sshll.u32 %s204_s26, 4  ;;  %p2002_p9 = pneg %p2229_p8  ;;  %s206_s8 = int_to_ptr.hbm [resolvable:$true] %s205_s8 }
  0x1c   : > { %s1998_s28 = sshra.s32 %s206_s8, 4  ;;  %s2005_s13 = scalar_lea.hbm %s2889_s0, 128  ;;  %s1999_s28 = int_to_ptr.hbm [resolvable:$true] %s1998_s28 }
  0x1d   : > { %s2000_s3 = scalar_lea.hbm %s1999_s28, 64  ;;  %p2006_p7 = scmp.lt.s32.totalorder %s1999_s28, %s2889_s0 }
  0x1e   : > { %p2001_p5 = scmp.ne.s32.totalorder %s1999_s28, %s2000_s3  ;;  %p2007_p3 = scmp.lt.s32.totalorder %s2005_s13, %s2000_s3 }
  0x20   : > { %p2003_p10 = pnand %p2002_p9, %p2001_p5  ;;  %p2008_p0 = por %p2007_p3, %p2006_p7 }
  0x22   : > { %p2004_p2 = pneg %p2003_p10 }
  0x24   : > { %p2009_p1 = pnand %p2008_p0, %p2004_p2 }
  0x26   : > { %2012 = shalt.err (!%p2009_p1)
}
  0x27   : > { %s2101_s11 = smov 256   ;;  %s2102_s15 = smov 16  }
  0x28   : > { %1895 = dma.hbm_to_vmem [thread:$0]  (!%p2229_p8), %s206_s8, 1024, %s208_s17, %s196_s9, %s2101_s11, %s2101_s11, %s2102_s15  }
  0x29   : > { %219 = sbr.rel (%p2212_p13) target bundleno = 1438 (0x59e), region = 40  ;;  %s2250_s23 = sand.u32 (!%p2212_p13), 1, %s2090_s19  }
  0x2a   : > { %s1753_s27 = sshll.u32 (!%p2212_p13), %s2250_s23, 6  ;;  %s222_s25 = scalar_lea.sflag (!%p2212_p13), [#allocation4], %s2250_s23 }
  0x2b   : > { %s2254_s3 = scalar_lea.vmem (!%p2212_p13), [#allocation3], %s1753_s27 }
  0x2e   : > { %2073 = dma.done.wait (%p2197_p6), %s222_s25, 1024  }
  0x2f   : > { %2075 = vsyncadd (%p2197_p6), %s222_s25, 4294966272 }
  0x30   : > { %2077 = dma.done.wait (%p43_p4), [#allocation6], 16  }
  0x31   : > { %2079 = vsyncadd (%p43_p4), [#allocation6], 4294967280 }
  0x32   : > { %236 = sfence }
  0x33   : > { %s2264_s7 = scalar_lea.vmem [#allocation8], %s1753_s27  ;;  %p2904_p13 = scmp.ne.s32.totalorder %s2173_s22, 0 }
  0x35   : > { %262 = sbr.rel (%p2904_p13) target bundleno = 60 (0x3c), region = 52 }
  0x3a   : > { %v2103_v0 = vmov 0.0  }
  0x3b   : > { %263 = vst [vmem:[#allocation2] sm:$0xff] %v2103_v0 }
  0x3c PF: > { %v2269_v1 = vld [vmem:[%s2254_s3 + $0x10] sm:$0xff]  ;;  %v2104_v2 = vmov 0.00390625   ;;  %v2272_v3 = vld [vmem:[%s2254_s3 + $0x18] sm:$0xff]  ;;  %v2277_v5 = vld [vmem:[%s2254_s3] sm:$0xff]  ;;  %vm347_vm0 = vcmask 7168   ;;  %vm352_vm1 = vcmask 261120  }
  0x3d   : > { %272 = vmatpush.msra.mxu0 %v2104_v2  ;;  %301 = vmatpush.msra.mxu1 %v2104_v2  ;;  %v333_v4 = vmax.f32 %v2269_v1, %v2272_v3  ;;  %v2280_v6 = vld [vmem:[%s2254_s3 + $0x8] sm:$0xff]  ;;  %v2285_v8 = vld [vmem:[%s2254_s3 + $0x30] sm:$0xff]  ;;  %v2288_v9 = vld [vmem:[%s2254_s3 + $0x38] sm:$0xff]  ;;  %vm390_vm2 = vcmask 1041408   ;;  %vm377_vm3 = vcmask 15360   ;;  %s2105_s16 = smov 127  }
  0x3e   : > { %v330_v7 = vmax.f32 %v2277_v5, %v2280_v6  ;;  %v339_v10 = vmax.f32 %v2285_v8, %v2288_v9  ;;  %v2293_v11 = vld [vmem:[%s2254_s3 + $0x20] sm:$0xff]  ;;  %v2296_v12 = vld [vmem:[%s2254_s3 + $0x28] sm:$0xff]  ;;  %v342_v33 = vld [vmem:[%s2890_s1] sm:$0x3]  ;;  %v2106_v45 = vmov 0   ;;  %s1773_s11 = sld [smem:[#allocation7 + $0x23]] }
  0x3f   : > { %273 = vmatpush.msra.mxu0 %v2104_v2  ;;  %302 = vmatpush.msra.mxu1 %v2104_v2  ;;  %v336_v13 = vmax.f32 %v2293_v11, %v2296_v12  ;;  %v343_v37 = vld [vmem:[%s2891_s2] sm:$0xff]  ;;  %v344_v38 = vld [vmem:[%s2891_s2 + $0x8] sm:$0xff]  ;;  %v345_v39 = vld [vmem:[%s2891_s2 + $0x10] sm:$0xff]  ;;  %s1770_s15 = sld [smem:[#allocation7 + $0xe]]  ;;  %s2108_s12 = smov 48  }
  0x40   : > { %334 = vmax.xlane.f32.xlu1 %v333_v4  ;;  %340 = vmax.xlane.f32.xlu0 %v339_v10  ;;  %v346_v40 = vld [vmem:[%s2891_s2 + $0x18] sm:$0xff]  ;;  %s1769_s27 = sld [smem:[#allocation7 + $0x7]]  ;;  %s2109_s17 = smov 96  }
  0x41   : > { %274 = vmatpush.msra.mxu0 %v2104_v2  ;;  %303 = vmatpush.msra.mxu1 %v2104_v2  ;;  %s1777_s25 = sld [smem:[#allocation7 + $0x3f]]  ;;  %s2110_s26 = smov 112  }
  0x42   : > { %1959 = vset.pattern.permute.xlu0 %v2106_v45  ;;  %1958 = vset.pattern.permute.xlu2 %v2106_v45  ;;  %s1772_s3 = sld [smem:[#allocation7 + $0x1c]]  ;;  %s2111_s10 = smov 64  }
  0x43   : > { %275 = vmatpush.msra.mxu0 %v2104_v2  ;;  %304 = vmatpush.msra.mxu1 %v2104_v2  ;;  %s1771_s29 = sld [smem:[#allocation7 + $0x15]]  ;;  %s2112_s14 = smov 80  }
  0x44   : > { %s1780_s8 = sld [smem:[#allocation7 + $0x54]] }
  0x45   : > { %276 = vmatpush.msra.mxu0 %v2104_v2  ;;  %305 = vmatpush.msra.mxu1 %v2104_v2  ;;  %s1776_s9 = sld [smem:[#allocation7 + $0x38]] }
  0x46   : > { %s1774_s28 = sld [smem:[#allocation7 + $0x2a]] }
  0x47   : > { %277 = vmatpush.msra.mxu0 %v2104_v2  ;;  %306 = vmatpush.msra.mxu1 %v2104_v2  ;;  %s1783_s13 = sld [smem:[#allocation7 + $0x8]] }
  0x48   : > { %331 = vmax.xlane.f32.xlu1 %v330_v7  ;;  %337 = vmax.xlane.f32.xlu0 %v336_v13 }
  0x49   : > { %278 = vmatpush.msra.mxu0 %v2104_v2  ;;  %307 = vmatpush.msra.mxu1 %v2104_v2 }
  0x4b   : > { %279 = vmatpush.msra.mxu0 %v2104_v2  ;;  %308 = vmatpush.msra.mxu1 %v2104_v2 }
  0x4d   : > { %280 = vmatpush.msra.mxu0 %v2104_v2  ;;  %309 = vmatpush.msra.mxu1 %v2104_v2 }
  0x4f   : > { %281 = vmatpush.msra.mxu0 %v2104_v2  ;;  %310 = vmatpush.msra.mxu1 %v2104_v2 }
  0x51   : > { %282 = vmatpush.msra.mxu0 %v2104_v2  ;;  %311 = vmatpush.msra.mxu1 %v2104_v2 }
  0x53   : > { %283 = vmatpush.msra.mxu0 %v2104_v2  ;;  %312 = vmatpush.msra.mxu1 %v2104_v2 }
  0x55   : > { %284 = vmatpush.msra.mxu0 %v2104_v2  ;;  %313 = vmatpush.msra.mxu1 %v2104_v2 }
  0x57   : > { %285 = vmatpush.msra.mxu0 %v2104_v2  ;;  %314 = vmatpush.msra.mxu1 %v2104_v2 }
  0x59   : > { %286 = vmatpush.msra.mxu0 %v2104_v2  ;;  %315 = vmatpush.msra.mxu1 %v2104_v2 }
  0x5b   : > { %287 = vmatpush.msra.mxu0 %v2104_v2  ;;  %316 = vmatpush.msra.mxu1 %v2104_v2 }
  0x5c   : > { %288 = vmatmul.f32.vlgmr.msra.gmra.mxu0 %v2277_v5  ;;  %317 = vmatmul.f32.vlgmr.msra.gmra.mxu1 %v2280_v6 }
  0x64   : > { %291 = vmatmul.f32.gmra.mxu0 %v2269_v1  ;;  %320 = vmatmul.f32.gmra.mxu1 %v2272_v3 }
  0x6c   : > { %294 = vmatmul.f32.gmra.mxu0 %v2293_v11  ;;  %323 = vmatmul.f32.gmra.mxu1 %v2296_v12 }
  0x74   : > { %297 = vmatmul.f32.gmra.mxu0 %v2285_v8  ;;  %326 = vmatmul.f32.gmra.mxu1 %v2288_v9 }
  0xb3   : > { %v341_v18 = vpop.xlane.xlu0 %340  ;;  %v335_v21 = vpop.xlane.xlu1 %334 }
  0xbb   : > { %v338_v26 = vpop.xlane.xlu0 %337  ;;  %v332_v31 = vpop.xlane.xlu1 %331 }
  0xd9   : > { %v289_v14 = vpop.f32.mrf.mxu0  ;;  %v318_v15 = vpop.f32.mrf.mxu1 }
  0xda   : > { %v319_v29 = vadd.f32 %v318_v15, %v289_v14 }
  0xdc   : > { %v348_v34 = vsel %vm347_vm0, %v319_v29, %v332_v31 }
  0xe1   : > { %v292_v16 = vpop.f32.mrf.mxu0  ;;  %v321_v17 = vpop.f32.mrf.mxu1 }
  0xe2   : > { %v322_v27 = vadd.f32 %v321_v17, %v292_v16 }
  0xe4   : > { %v349_v32 = vsel %vm347_vm0, %v322_v27, %v335_v21 }
  0xe9   : > { %v295_v19 = vpop.f32.mrf.mxu0  ;;  %v324_v20 = vpop.f32.mrf.mxu1 }
  0xea   : > { %v325_v24 = vadd.f32 %v324_v20, %v295_v19 }
  0xec   : > { %v350_v30 = vsel %vm347_vm0, %v325_v24, %v338_v26 }
  0xf1   : > { %v298_v22 = vpop.f32.mrf.mxu0  ;;  %v327_v23 = vpop.f32.mrf.mxu1 }
  0xf2   : > { %v328_v25 = vadd.f32 %v327_v23, %v298_v22 }
  0xf4   : > { %v351_v28 = vsel %vm347_vm0, %v328_v25, %v341_v18 }
  0xf5   : > { %368 = vmatpush.msra.mxu2 %v351_v28 }
  0xf7   : > { %369 = vmatpush.msra.mxu2 %v350_v30 }
  0xf9   : > { %370 = vmatpush.msra.mxu2 %v349_v32 }
  0xfb   : > { %371 = vmatpush.msra.mxu2 %v348_v34 }
  0xfc   : > { %1757 = vmatmul.msk.f32.vlgmr.msra.gmra.mxu2 %vm352_vm1, %v342_v33 }
 0x17f   : > { %v373_v35 = vpop.f32.mrf.mxu2 }
 0x180   : > { %v376_v36 = vmax.f32 %v373_v35, 0.0 }
 0x182   : > { %1758 = vmatpush.msk.msra.mxu3 %vm390_vm2, %v376_v36 }
 0x183   : > { %1759 = vmatmul.msk.f32.vlgmr.msra.gmra.mxu3 %vm377_vm3, %v343_v37 }
 0x18b   : > { %1760 = vmatmul.msk.f32.gmra.mxu3 %vm377_vm3, %v344_v38 }
 0x193   : > { %1761 = vmatmul.msk.f32.gmra.mxu3 %vm377_vm3, %v345_v39 }
 0x19b   : > { %1762 = vmatmul.msk.f32.gmra.mxu3 %vm377_vm3, %v346_v40 }
 0x206   : > { %v411_v41 = vpop.f32.mrf.mxu3 }
 0x207   : > { %427 = vrot.lane.b32.xlu1 %v411_v41, %s2105_s16 }
 0x20e   : > { %v414_v42 = vpop.f32.mrf.mxu3 }
 0x20f   : > { %429 = vrot.lane.b32.xlu0 %v414_v42, %s2105_s16 }
 0x216   : > { %v417_v43 = vpop.f32.mrf.mxu3 }
 0x21e   : > { %v420_v44 = vpop.f32.mrf.mxu3 }
 0x21f   : > { %433 = vrot.lane.b32.xlu2 %v420_v44, %s2105_s16 }
 0x227   : > { %431 = vrot.lane.b32.xlu2 %v417_v43, %s2105_s16  ;;  %s1779_s16 = sld [smem:[#allocation7 + $0x4d]] }
 0x279   : > { %v428_v46 = vpop.permute.xlu1 %427  ;;  %v434_v47 = vpop.permute.xlu2 %433 }
 0x27a   : > { %v439_v48 = vadd.f32 %v428_v46, %v411_v41  ;;  %v442_v49 = vadd.f32 %v434_v47, %v420_v44 }
 0x27c   : > { %v1763_v50 = vmul.f32 -1.442695, %v439_v48  ;;  %v1766_v51 = vmul.f32 -1.442695, %v442_v49 }
 0x27e   : > { %1960 = vpow2.f32 %v1763_v50 }
 0x27f   : > { %1962 = vpow2.f32 %v1766_v51 }
 0x281   : > { %v430_v52 = vpop.permute.xlu0 %429  ;;  %v432_v53 = vpop.permute.xlu2 %431 }
 0x282   : > { %v440_v54 = vadd.f32 %v430_v52, %v414_v42  ;;  %v441_v55 = vadd.f32 %v432_v53, %v417_v43 }
 0x284   : > { %v1961_v56 = vpop.eup %1960  ;;  %v1764_v57 = vmul.f32 -1.442695, %v440_v54  ;;  %v1765_v59 = vmul.f32 -1.442695, %v441_v55 }
 0x285   : > { %v455_v58 = vadd.f32 1.0, %v1961_v56  ;;  %v1963_v60 = vpop.eup %1962 }
 0x286   : > { %v458_v61 = vadd.f32 1.0, %v1963_v60 }
 0x287   : > { %1964 = vrcp.f32 %v455_v58  ;;  %v468_v10 = vand.u32 2147483647, %v455_v58  ;;  %v470_v13 = vand.u32 2147483648, %v455_v58  ;;  %vm464_vm5 = vweird.f32 %v455_v58 }
 0x288   : > { %1966 = vpow2.f32 %v1764_v57  ;;  %v515_v38 = vand.u32 2147483648, %v458_v61  ;;  %vm509_vm13 = vweird.f32 %v458_v61  ;;  %v513_v39 = vand.u32 2147483647, %v458_v61 }
 0x289   : > { %1968 = vpow2.f32 %v1765_v59  ;;  %v471_v18 = vor.u32 1.1754944e-38, %v470_v13  ;;  %vm469_vm7 = vcmp.eq.f32.partialorder %v468_v10, 8.507059e+37 }
 0x28a   : > { %1970 = vrcp.f32 %v458_v61  ;;  %v516_v42 = vor.u32 1.1754944e-38, %v515_v38  ;;  %vm514_vm15 = vcmp.eq.f32.partialorder %v513_v39, 8.507059e+37  ;;  %v738_v39 = vstv %s1780_s8  ;;  %s1788_s8 = sld [smem:[#allocation7 + $0x2b]] }
 0x28d   : > { %v1965_v62 = vpop.eup %1964 }
 0x28e   : > { %v1967_v63 = vpop.eup %1966  ;;  %v460_v0 = vmul.f32 %v1965_v62, %v455_v58  ;;  %vm465_vm4 = vweird.f32 %v1965_v62 }
 0x28f   : > { %v1969_v2 = vpop.eup %1968  ;;  %v456_v14 = vadd.f32 1.0, %v1967_v63  ;;  %vm466_vm6 = vmor %vm464_vm5, %vm465_vm4 }
 0x290   : > { %v457_v4 = vadd.f32 1.0, %v1969_v2  ;;  %v461_v7 = vsub.f32 1.0, %v460_v0  ;;  %v1971_v16 = vpop.eup %1970 }
 0x291   : > { %v505_v21 = vmul.f32 %v1971_v16, %v458_v61  ;;  %vm510_vm12 = vweird.f32 %v1971_v16  ;;  %v485_v45 = vand.u32 2147483648, %v456_v14  ;;  %vm479_vm3 = vweird.f32 %v456_v14 }
 0x292   : > { %1972 = vrcp.f32 %v457_v4  ;;  %v462_v15 = vmul.f32 %v1965_v62, %v461_v7  ;;  %v500_v27 = vand.u32 2147483648, %v457_v4  ;;  %v498_v29 = vand.u32 2147483647, %v457_v4  ;;  %vm511_vm14 = vmor %vm509_vm13, %vm510_vm12 }
 0x293   : > { %1974 = vrcp.f32 %v456_v14  ;;  %v506_v25 = vsub.f32 1.0, %v505_v21  ;;  %vm494_vm9 = vweird.f32 %v457_v4  ;;  %v483_v46 = vand.u32 2147483647, %v456_v14 }
 0x294   : > { %v463_v17 = vadd.f32 %v1965_v62, %v462_v15  ;;  %v501_v33 = vor.u32 1.1754944e-38, %v500_v27  ;;  %vm499_vm11 = vcmp.eq.f32.partialorder %v498_v29, 8.507059e+37  ;;  %v486_v48 = vor.u32 1.1754944e-38, %v485_v45 }
 0x295   : > { %v507_v31 = vmul.f32 %v1971_v16, %v506_v25  ;;  %vm484_vm5 = vcmp.eq.f32.partialorder %v483_v46, 8.507059e+37  ;;  %v623_v25 = vstv %s1769_s27  ;;  %s1786_s27 = sld [smem:[#allocation7 + $0x1d]]  ;;  %v772_v45 = vstv %s1783_s13 }
 0x296   : > { %v467_v19 = vsel %vm466_vm6, %v1965_v62, %v463_v17  ;;  %vm608_vm6 = vcmask 1040384   ;;  %v728_v46 = vstv %s1779_s16  ;;  %s1792_s13 = sld [smem:[#allocation7 + $0x47]]  ;;  %vm901_vm12 = vcmask 408576  }
 0x297   : > { %v472_v20 = vsel %vm469_vm7, %v471_v18, %v467_v19  ;;  %v508_v36 = vadd.f32 %v1971_v16, %v507_v31  ;;  %s1787_s16 = sld [smem:[#allocation7 + $0x24]]  ;;  %vm640_vm7 = vcmask 785408   ;;  %vm1460_vm13 = vcmask 375808  }
 0x298   : > { %v1973_v22 = vpop.eup %1972  ;;  %521 = vperm.xlu0 %1959, %v472_v20  }
 0x299   : > { %v490_v23 = vmul.f32 %v1973_v22, %v457_v4  ;;  %v1975_v26 = vpop.eup %1974  ;;  %vm495_vm8 = vweird.f32 %v1973_v22  ;;  %v512_v40 = vsel %vm511_vm14, %v1971_v16, %v508_v36  ;;  %vm1321_vm14 = vcmask 384000  }
 0x29a   : > { %v475_v32 = vmul.f32 %v1975_v26, %v456_v14  ;;  %vm496_vm10 = vmor %vm494_vm9, %vm495_vm8  ;;  %v517_v43 = vsel %vm514_vm15, %v516_v42, %v512_v40  ;;  %vm480_vm0 = vweird.f32 %v1975_v26  ;;  %v696_v40 = vstv %s1776_s9  ;;  %s1784_s9 = sld [smem:[#allocation7 + $0xf]] }
 0x29b   : > { %v491_v24 = vsub.f32 1.0, %v490_v23  ;;  %vm481_vm4 = vmor %vm479_vm3, %vm480_vm0  ;;  %v669_v23 = vstv %s1773_s11  ;;  %s1778_s11 = sld [smem:[#allocation7 + $0x46]]  ;;  %vm651_vm8 = vcmask 654336   ;;  %vm664_vm9 = vcmask 523264  }
 0x29c   : > { %v476_v37 = vsub.f32 1.0, %v475_v32  ;;  %v706_v32 = vstv %s1777_s25  ;;  %s1785_s25 = sld [smem:[#allocation7 + $0x16]]  ;;  %vm1599_vm15 = vcmask 367616  }
 0x29d   : > { %v492_v28 = vmul.f32 %v1973_v22, %v491_v24  ;;  %v634_v24 = vstv %s1770_s15  ;;  %s2113_s15 = smov 32  }
 0x29e   : > { %v477_v41 = vmul.f32 %v1975_v26, %v476_v37 }
 0x29f   : > { %v493_v30 = vadd.f32 %v1973_v22, %v492_v28 }
 0x2a0   : > { %v478_v44 = vadd.f32 %v1975_v26, %v477_v41  ;;  %v680_v41 = vstv %s1774_s28  ;;  %s1793_s28 = sld [smem:[#allocation7 + $0x4e]] }
 0x2a1   : > { %v497_v34 = vsel %vm496_vm10, %v1973_v22, %v493_v30  ;;  %vm675_vm10 = vcmask 392192  }
 0x2a2   : > { %v502_v35 = vsel %vm499_vm11, %v501_v33, %v497_v34  ;;  %v482_v47 = vsel %vm481_vm4, %v1975_v26, %v478_v44  ;;  %v658_v33 = vstv %s1772_s3  ;;  %v645_v34 = vstv %s1771_s29  ;;  %s1781_s3 = sld [smem:[#allocation7 + $0x5b]] }
 0x2a3   : > { %531 = vperm.xlu2 %1958, %v502_v35   ;;  %v487_v49 = vsel %vm484_vm5, %v486_v48, %v482_v47  ;;  %v716_v47 = vstv %s1778_s11  ;;  %s1790_s29 = sld [smem:[#allocation7 + $0x39]]  ;;  %vm762_vm11 = vcmask 416768  }
 0x2a4   : > { %s1800_s11 = sld [smem:[#allocation7 + $0x17]] }
 0x2ab   : > { %536 = vperm.xlu2 %1958, %v517_v43  }
 0x2b3   : > { %526 = vperm.xlu2 %1958, %v487_v49  }
 0x2fd   : > { %v532_v50 = vpop.permute.xlu2 %531 }
 0x2fe   : > { %v2329_v53 = vmul.f32 %v532_v50, %v2293_v11  ;;  %v2107_v11 = vmov 0.03125   ;;  %v2346_v58 = vmul.f32 %v532_v50, %v2296_v12 }
 0x305   : > { %v537_v51 = vpop.permute.xlu2 %536 }
 0x306   : > { %v2326_v52 = vmul.f32 %v537_v51, %v2285_v8  ;;  %v2341_v8 = vmul.f32 %v537_v51, %v2288_v9  ;;  %v802_v51 = vstv %s1786_s27  ;;  %s1795_s27 = sld [smem:[#allocation7 + $0x5c]] }
 0x308   : > { %562 = vmatpush.msrb.mxu2 %v2326_v52 }
 0x30a   : > { %563 = vmatpush.msrb.mxu2 %v2329_v53  ;;  %v522_v54 = vpop.permute.xlu0 %521 }
 0x30b   : > { %v2337_v57 = vmul.f32 %v522_v54, %v2277_v5  ;;  %v2354_v5 = vmul.f32 %v522_v54, %v2280_v6  ;;  %v792_v54 = vstv %s1785_s25  ;;  %s1791_s25 = sld [smem:[#allocation7 + $0x40]] }
 0x30d   : > { %v527_v55 = vpop.permute.xlu2 %526  ;;  %v599_v9 = vmax.f32 %v2354_v5, %v2346_v58 }
 0x30e   : > { %v2334_v56 = vmul.f32 %v527_v55, %v2269_v1  ;;  %v2350_v1 = vmul.f32 %v527_v55, %v2272_v3  ;;  %v590_v3 = vmax.f32 %v2337_v57, %v2329_v53  ;;  %v748_v55 = vstv %s1781_s3  ;;  %s1803_s3 = sld [smem:[#allocation7 + $0x2c]] }
 0x310   : > { %564 = vmatpush.msrb.mxu2 %v2334_v56  ;;  %v600_v12 = vmax.f32 %v2350_v1, %v2341_v8  ;;  %v591_v59 = vmax.f32 %v2334_v56, %v2326_v52 }
 0x312   : > { %565 = vmatpush.msrb.mxu2 %v2337_v57  ;;  %v601_v6 = vmax.f32 %v599_v9, %v600_v12  ;;  %v592_v60 = vmax.f32 %v590_v3, %v591_v59  ;;  %v836_v3 = vstv %s1790_s29  ;;  %v822_v59 = vstv %s1788_s8  ;;  %s1799_s29 = sld [smem:[#allocation7 + $0x10]] }
 0x313   : > { %1767 = vmatmul.msk.f32.vlgmr.msrb.gmra.mxu2 %vm352_vm1, %v2107_v11  ;;  %s1794_s8 = sld [smem:[#allocation7 + $0x55]] }
 0x314   : > { %582 = vmatpush.msra.mxu2 %v2341_v8  ;;  %v602_v61 = vrot.slane %v601_v6, 4  ;;  %v593_v62 = vrot.slane %v592_v60, 4 }
 0x316   : > { %583 = vmatpush.msra.mxu2 %v2346_v58  ;;  %v603_v63 = vmax.f32 %v601_v6, %v602_v61  ;;  %v594_v0 = vmax.f32 %v592_v60, %v593_v62  ;;  %v782_v6 = vstv %s1784_s9  ;;  %s1807_s9 = sld [smem:[#allocation7 + $0x48]] }
 0x318   : > { %584 = vmatpush.msra.mxu2 %v2350_v1  ;;  %v604_v2 = vrot.slane %v603_v63, 2  ;;  %v595_v4 = vrot.slane %v594_v0, 2 }
 0x31a   : > { %585 = vmatpush.msra.mxu2 %v2354_v5  ;;  %v605_v7 = vmax.f32 %v603_v63, %v604_v2  ;;  %v596_v13 = vmax.f32 %v594_v0, %v595_v4  ;;  %v866_v63 = vstv %s1793_s28  ;;  %v856_v0 = vstv %s1792_s13  ;;  %s1802_s28 = sld [smem:[#allocation7 + $0x25]] }
 0x31b   : > { %1768 = vmatmul.msk.f32.vlgmr.msra.gmra.mxu2 %vm352_vm1, %v2107_v11  ;;  %v812_v2 = vstv %s1787_s16  ;;  %s1798_s13 = sld [smem:[#allocation7 + $0x9]] }
 0x31c   : > { %v606_v14 = vrot.slane %v605_v7, 1  ;;  %v597_v15 = vrot.slane %v596_v13, 1  ;;  %s1810_s16 = sld [smem:[#allocation7 + $0x5d]] }
 0x31e   : > { %v607_v16 = vmax.f32 %v605_v7, %v606_v14  ;;  %v598_v18 = vmax.f32 %v596_v13, %v597_v15  ;;  %v931_v13 = vstv %s1800_s11  ;;  %v886_v14 = vstv %s1795_s27  ;;  %s1806_s11 = sld [smem:[#allocation7 + $0x41]] }
 0x31f   : > { %v846_v15 = vstv %s1791_s25  ;;  %s1801_s27 = sld [smem:[#allocation7 + $0x1e]] }
 0x320   : > { %s1814_s25 = sld [smem:[#allocation7 + $0x11]] }
 0x396   : > { %v567_v10 = vpop.f32.mrf.mxu2 }
 0x397   : > { %v609_v21 = vsel %vm608_vm6, %v567_v10, %v598_v18 }
 0x39e   : > { %v587_v17 = vpop.f32.mrf.mxu2 }
 0x39f   : > { %v610_v19 = vsel %vm608_vm6, %v587_v17, %v607_v16 }
 0x3a0   : > { %v613_v20 = vrot.slane %v610_v19, 6  ;;  %v961_v19 = vstv %s1803_s3  ;;  %s1809_s3 = sld [smem:[#allocation7 + $0x56]] }
 0x3a2   : > { %v614_v22 = vsel %vm390_vm2, %v609_v21, %v613_v20  ;;  %v921_v20 = vstv %s1799_s29  ;;  %v876_v21 = vstv %s1794_s8  ;;  %s1805_s29 = sld [smem:[#allocation7 + $0x3a]]  ;;  %vm629_vm2 = vcmask 916480  }
 0x3a3   : > { %616 = vst [vmem:[#allocation2 + $0x2] sm:$0xf] %v614_v22  ;;  %s617_s8 = sld [smem:[#allocation7]] }
 0x3aa   : > { %v2368_v26 = vld [vmem:[#allocation2] ss:$2 sm:$0x7]  ;;  %v2378_v31 = vld [vmem:[#allocation2 + $0x1] ss:$2 sm:$0x7] }
 0x3ab   : > { %v2370_v27 = vld [vmem:[#allocation2 + $0x2] ss:$2 sm:$0x7]  ;;  %v635_v29 = vmul.f32 %v634_v24, %v2368_v26  ;;  %v624_v30 = vmul.f32 %v623_v25, %v2368_v26  ;;  %v707_v35 = vmul.f32 %v706_v32, %v2378_v31  ;;  %v646_v37 = vmul.f32 %v645_v34, %v2368_v26  ;;  %v2386_v38 = vld [vmem:[#allocation2 + $0x3] ss:$2 sm:$0x7] }
 0x3ac   : > { %v670_v28 = vmul.f32 %v669_v23, %v2370_v27  ;;  %v659_v36 = vmul.f32 %v658_v33, %v2370_v27  ;;  %v739_v42 = vmul.f32 %v738_v39, %v2386_v38  ;;  %v697_v43 = vmul.f32 %v696_v40, %v2378_v31 }
 0x3ad   : > { %637 = vrot.lane.b32.xlu1 %v635_v29, %s2109_s17  ;;  %626 = vrot.lane.b32.xlu2 %v624_v30, %s2110_s26  ;;  %v681_v44 = vmul.f32 %v680_v41, %v2370_v27  ;;  %v773_v48 = vmul.f32 %v772_v45, %v2368_v26  ;;  %v729_v49 = vmul.f32 %v728_v46, %v2386_v38  ;;  %v995_v25 = vstv %s1807_s9  ;;  %s1829_s9 = sld [smem:[#allocation7 + $0x12]] }
 0x3ae   : > { %672 = vrot.lane.b32.xlu0 %v670_v28, %s2108_s12  ;;  %v717_v50 = vmul.f32 %v716_v47, %v2378_v31  ;;  %v803_v11 = vmul.f32 %v802_v51, %v2370_v27  ;;  %v793_v9 = vmul.f32 %v792_v54, %v2368_v26  ;;  %v749_v12 = vmul.f32 %v748_v55, %v2386_v38 }
 0x3af   : > { %v837_v60 = vmul.f32 %v836_v3, %v2378_v31  ;;  %v823_v61 = vmul.f32 %v822_v59, %v2370_v27  ;;  %v783_v62 = vmul.f32 %v782_v6, %v2368_v26  ;;  %v867_v4 = vmul.f32 %v866_v63, %v2386_v38 }
 0x3b0   : > { %v857_v7 = vmul.f32 %v856_v0, %v2378_v31  ;;  %v813_v10 = vmul.f32 %v812_v2, %v2370_v27  ;;  %v932_v16 = vmul.f32 %v931_v13, %v2368_v26  ;;  %v887_v17 = vmul.f32 %v886_v14, %v2386_v38 }
 0x3b1   : > { %v847_v18 = vmul.f32 %v846_v15, %v2378_v31  ;;  %v962_v22 = vmul.f32 %v961_v19, %v2370_v27  ;;  %v922_v23 = vmul.f32 %v921_v20, %v2368_v26  ;;  %v877_v24 = vmul.f32 %v876_v21, %v2386_v38 }
 0x3b2   : > { %v951_v28 = vstv %s1802_s28  ;;  %v911_v29 = vstv %s1798_s13  ;;  %v996_v30 = vmul.f32 %v995_v25, %v2378_v31  ;;  %v1025_v34 = vstv %s1810_s16  ;;  %s1813_s28 = sld [smem:[#allocation7 + $0xa]] }
 0x3b3   : > { %v952_v32 = vmul.f32 %v951_v28, %v2370_v27  ;;  %v912_v33 = vmul.f32 %v911_v29, %v2368_v26  ;;  %v1060_v41 = vstv %s1814_s25  ;;  %s1808_s13 = sld [smem:[#allocation7 + $0x4f]]  ;;  %v619_v47 = vstv %s617_s8 }
 0x3b4   : > { %s1830_s16 = sld [smem:[#allocation7 + $0x19]]  ;;  %v620_v55 = vmul.f32 %v619_v47, %v2368_v26 }
 0x3b5   : > { %661 = vrot.lane.b32.xlu1 %v659_v36, %s2111_s10  ;;  %648 = vrot.lane.b32.xlu2 %v646_v37, %s2112_s14  ;;  %v941_v36 = vstv %s1801_s27  ;;  %v1026_v37 = vmul.f32 %v1025_v34, %v2386_v38  ;;  %s1828_s27 = sld [smem:[#allocation7 + $0xb]] }
 0x3b6   : > { %709 = vrot.lane.b32.xlu0 %v707_v35, %s2109_s17  ;;  %v985_v35 = vstv %s1806_s11  ;;  %v942_v40 = vmul.f32 %v941_v36, %v2370_v27  ;;  %s1815_s11 = sld [smem:[#allocation7 + $0x18]] }
 0x3b7   : > { %v986_v39 = vmul.f32 %v985_v35, %v2378_v31  ;;  %s1817_s25 = sld [smem:[#allocation7 + $0x26]] }
 0x3b8   : > { %s1859_s8 = sld [smem:[#allocation7 + $0x14]] }
 0x3b9   : > { %v1005_v54 = vstv %s1808_s13  ;;  %s2467_s13 = sld [smem:[#allocation7 + $0x21]] }
 0x3ba   : > { %v1006_v59 = vmul.f32 %v1005_v54, %v2386_v38 }
 0x3bb   : > { %v1192_v63 = vstv %s1828_s27  ;;  %s2480_s27 = sld [smem:[#allocation7 + $0x31]] }
 0x3bd   : > { %699 = vrot.lane.b32.xlu1 %v697_v43, %s2110_s26  ;;  %683 = vrot.lane.b32.xlu2 %v681_v44, %s2113_s15  ;;  %v975_v43 = vstv %s1805_s29  ;;  %v1061_v44 = vmul.f32 %v1060_v41, %v2368_v26  ;;  %s1843_s29 = sld [smem:[#allocation7 + $0xc]] }
 0x3be   : > { %741 = vrot.lane.b32.xlu0 %v739_v42, %s2108_s12  ;;  %v1015_v42 = vstv %s1809_s3  ;;  %v976_v46 = vmul.f32 %v975_v43, %v2378_v31  ;;  %s1816_s3 = sld [smem:[#allocation7 + $0x1f]] }
 0x3bf   : > { %v1016_v45 = vmul.f32 %v1015_v42, %v2386_v38  ;;  %v1361_v42 = vstv %s2467_s13  ;;  %s2516_s13 = sld [smem:[#allocation7 + $0x1b]] }
 0x3c1   : > { %v692_v54 = vstv %s2480_s27  ;;  %s2537_s27 = sld [smem:[#allocation7 + $0x22]] }
 0x3c3   : > { %v1331_v14 = vstv %s1843_s29  ;;  %s2494_s29 = sld [smem:[#allocation7 + $0x2d]] }
 0x3c4   : > { %v1082_v13 = vstv %s1816_s3  ;;  %s2491_s3 = sld [smem:[#allocation7 + $0x27]] }
 0x3c5   : > { %731 = vrot.lane.b32.xlu1 %v729_v49, %s2111_s10  ;;  %719 = vrot.lane.b32.xlu2 %v717_v50, %s2112_s14  ;;  %v1202_v49 = vstv %s1829_s9  ;;  %v1050_v50 = vstv %s1813_s28  ;;  %s1858_s9 = sld [smem:[#allocation7 + $0xd]] }
 0x3c6   : > { %775 = vrot.lane.b32.xlu0 %v773_v48, %s2110_s26  ;;  %s1844_s28 = sld [smem:[#allocation7 + $0x13]] }
 0x3cc   : > { %v1341_v25 = vstv %s1844_s28  ;;  %s2513_s28 = sld [smem:[#allocation7 + $0x2e]] }
 0x3cd   : > { %795 = vrot.lane.b32.xlu1 %v793_v9, %s2112_s14  ;;  %751 = vrot.lane.b32.xlu2 %v749_v12, %s2113_s15  ;;  %v1203_v9 = vmul.f32 %v1202_v49, %v2368_v26  ;;  %v1051_v12 = vmul.f32 %v1050_v50, %v2368_v26  ;;  %v1342_v34 = vmul.f32 %v1341_v25, %v2368_v26 }
 0x3ce   : > { %805 = vrot.lane.b32.xlu0 %v803_v11, %s2111_s10 }
 0x3d5   : > { %825 = vrot.lane.b32.xlu1 %v823_v61, %s2113_s15  ;;  %785 = vrot.lane.b32.xlu2 %v783_v62, %s2109_s17  ;;  %v1071_v61 = vld [vmem:[#allocation2 + $0x2] ss:$2 sm:$0x3]  ;;  %v1072_v62 = vstv %s1815_s11  ;;  %s2473_s11 = sld [smem:[#allocation7 + $0x20]] }
 0x3d6   : > { %839 = vrot.lane.b32.xlu0 %v837_v60, %s2110_s26  ;;  %v1212_v60 = vstv %s1830_s16  ;;  %v1073_v2 = vmul.f32 %v1072_v62, %v1071_v61  ;;  %s2471_s16 = sld [smem:[#allocation7 + $0x1a]] }
 0x3d7   : > { %v1213_v0 = vmul.f32 %v1212_v60, %v2370_v27 }
 0x3dc   : > { %v1351_v43 = vstv %s2471_s16  ;;  %s2531_s16 = sld [smem:[#allocation7 + $0x3c]] }
 0x3dd   : > { %859 = vrot.lane.b32.xlu1 %v857_v7, %s2112_s14  ;;  %815 = vrot.lane.b32.xlu2 %v813_v10, %s2108_s12  ;;  %v1092_v10 = vstv %s1817_s25  ;;  %s2485_s25 = sld [smem:[#allocation7 + $0x28]]  ;;  %v1352_v49 = vmul.f32 %v1351_v43, %v2370_v27 }
 0x3de   : > { %869 = vrot.lane.b32.xlu0 %v867_v4, %s2111_s10  ;;  %v1193_v4 = vmul.f32 %v1192_v63, %v2368_v26  ;;  %v1093_v15 = vmul.f32 %v1092_v10, %v2370_v27  ;;  %v1232_v63 = vstv %s2491_s3  ;;  %s2555_s3 = sld [smem:[#allocation7 + $0x43]] }
 0x3e3   : > { %v1371_v62 = vstv %s2485_s25  ;;  %s2552_s25 = sld [smem:[#allocation7 + $0x32]] }
 0x3e5   : > { %889 = vrot.lane.b32.xlu1 %v887_v17, %s2113_s15  ;;  %849 = vrot.lane.b32.xlu2 %v847_v18, %s2109_s17  ;;  %v1332_v17 = vmul.f32 %v1331_v14, %v2368_v26  ;;  %v1233_v14 = vmul.f32 %v1232_v63, %v2370_v27 }
 0x3e6   : > { %934 = vrot.lane.b32.xlu0 %v932_v16, %s2112_s14  ;;  %v1083_v16 = vmul.f32 %v1082_v13, %v2370_v27  ;;  %v1372_v13 = vmul.f32 %v1371_v62, %v2370_v27 }
 0x3ed   : > { %924 = vrot.lane.b32.xlu1 %v922_v23, %s2109_s17  ;;  %879 = vrot.lane.b32.xlu2 %v877_v24, %s2108_s12  ;;  %v1480_v23 = vstv %s1859_s8  ;;  %v1470_v24 = vstv %s1858_s9  ;;  %s2506_s8 = sld [smem:[#allocation7 + $0x1]] }
 0x3ee   : > { %964 = vrot.lane.b32.xlu0 %v962_v22, %s2113_s15  ;;  %s2509_s9 = sld [smem:[#allocation7 + $0x2f]] }
 0x3f5   : > { %954 = vrot.lane.b32.xlu1 %v952_v32, %s2108_s12  ;;  %914 = vrot.lane.b32.xlu2 %v912_v33, %s2110_s26  ;;  %v1471_v32 = vmul.f32 %v1470_v24, %v2368_v26  ;;  %v1381_v24 = vstv %s2509_s9  ;;  %s1837_s9 = sld [smem:[#allocation7 + $0x4a]] }
 0x3f6   : > { %998 = vrot.lane.b32.xlu0 %v996_v30, %s2112_s14  ;;  %v1481_v30 = vmul.f32 %v1480_v23, %v2368_v26 }
 0x3fd   : > { %988 = vrot.lane.b32.xlu1 %v986_v39, %s2109_s17  ;;  %944 = vrot.lane.b32.xlu2 %v942_v40, %s2111_s10 }
 0x3fe   : > { %1028 = vrot.lane.b32.xlu0 %v1026_v37, %s2113_s15 }
 0x405   : > { %1018 = vrot.lane.b32.xlu1 %v1016_v45, %s2108_s12  ;;  %978 = vrot.lane.b32.xlu2 %v976_v46, %s2110_s26 }
 0x406   : > { %1063 = vrot.lane.b32.xlu0 %v1061_v44, %s2109_s17  ;;  %v1222_v44 = vstv %s2473_s11  ;;  %s2534_s11 = sld [smem:[#allocation7 + $0x3b]] }
 0x407   : > { %v627_v48 = vpop.permute.xlu2 %626 }
 0x408   : > { %v628_v51 = vrot.slane %v627_v48, 1 }
 0x40a   : > { %v630_v11 = vsel %vm629_vm2, %v627_v48, %v628_v51  ;;  %v1362_v48 = vmul.f32 %v1361_v42, %v2370_v27  ;;  %v1223_v51 = vmul.f32 %v1222_v44, %v2370_v27 }
 0x40b   : > { %v632_v3 = vadd.f32 %v630_v11, %v620_v55 }
 0x40d   : > { %1053 = vrot.lane.b32.xlu1 %v1051_v12, %s2110_s26  ;;  %1008 = vrot.lane.b32.xlu2 %v1006_v59, %s2111_s10  ;;  %v693_v12 = vmul.f32 %v692_v54, %v2378_v31 }
 0x40e   : > { %1205 = vrot.lane.b32.xlu0 %v1203_v9, %s2109_s17 }
 0x40f   : > { %v649_v6 = vpop.permute.xlu2 %648 }
 0x410   : > { %v650_v20 = vrot.slane %v649_v6, 1 }
 0x412   : > { %v652_v33 = vsel %vm651_vm8, %v649_v6, %v650_v20 }
 0x415   : > { %1075 = vrot.lane.b32.xlu1 %v1073_v2, %s2112_s14  ;;  %1195 = vrot.lane.b32.xlu2 %v1193_v4, %s2110_s26  ;;  %v1102_v2 = vstv %s2494_s29  ;;  %s2563_s29 = sld [smem:[#allocation7 + $0x42]] }
 0x416   : > { %1215 = vrot.lane.b32.xlu0 %v1213_v0, %s2112_s14 }
 0x417   : > { %v684_v7 = vpop.permute.xlu2 %683 }
 0x418   : > { %v685_v45 = vrot.slane %v684_v7, 7 }
 0x41a   : > { %v686_v11 = vsel %vm352_vm1, %v685_v45, %v684_v7 }
 0x41d   : > { %1085 = vrot.lane.b32.xlu1 %v1083_v16, %s2111_s10  ;;  %1334 = vrot.lane.b32.xlu2 %v1332_v17, %s2110_s26  ;;  %v1103_v16 = vmul.f32 %v1102_v2, %v2370_v27 }
 0x41e   : > { %1095 = vrot.lane.b32.xlu0 %v1093_v15, %s2108_s12 }
 0x41f   : > { %v638_v19 = vpop.permute.xlu1 %637  ;;  %v2469_v22 = vpop.permute.xlu2 %719 }
 0x420   : > { %v673_v18 = vpop.permute.xlu0 %672  ;;  %v639_v21 = vrot.slane %v638_v19, 1  ;;  %v721_v4 = vrot.slane %v2469_v22, 1 }
 0x421   : > { %v674_v39 = vrot.slane %v673_v18, 7 }
 0x422   : > { %v641_v28 = vsel %vm640_vm7, %v638_v19, %v639_v21  ;;  %v768_v19 = vstv %s2506_s8  ;;  %s1862_s8 = sld [smem:[#allocation7 + $0x29]] }
 0x423   : > { %v643_v29 = vadd.f32 %v641_v28, %v632_v3  ;;  %v676_v50 = vsel %vm675_vm10, %v674_v39, %v673_v18  ;;  %v722_v18 = vsel %vm651_vm8, %v2469_v22, %v721_v4  ;;  %v1382_v39 = vmul.f32 %v1381_v24, %v2370_v27 }
 0x425   : > { %1473 = vrot.lane.b32.xlu1 %v1471_v32, %s2110_s26  ;;  %v654_v35 = vadd.f32 %v652_v33, %v643_v29  ;;  %1344 = vrot.lane.b32.xlu2 %v1342_v34, %s2109_s17  ;;  %v1242_v32 = vstv %s2513_s28  ;;  %v1490_v33 = vstv %s2516_s13  ;;  %s1822_s28 = sld [smem:[#allocation7 + $0x49]] }
 0x426   : > { %1483 = vrot.lane.b32.xlu0 %v1481_v30, %s2109_s17  ;;  %v1491_v44 = vmul.f32 %v1490_v33, %v2370_v27  ;;  %s1863_s13 = sld [smem:[#allocation7 + $0x30]] }
 0x427   : > { %v662_v37 = vpop.permute.xlu1 %661  ;;  %v2487_v41 = vpop.permute.xlu2 %751 }
 0x428   : > { %v710_v36 = vpop.permute.xlu0 %709  ;;  %v663_v40 = vrot.slane %v662_v37, 7  ;;  %v753_v22 = vrot.slane %v2487_v41, 7 }
 0x429   : > { %v711_v6 = vrot.slane %v710_v36, 1 }
 0x42a   : > { %v665_v46 = vsel %vm664_vm9, %v663_v40, %v662_v37  ;;  %v1243_v40 = vmul.f32 %v1242_v32, %v2370_v27 }
 0x42b   : > { %v667_v47 = vadd.f32 %v665_v46, %v654_v35  ;;  %v712_v15 = vsel %vm640_vm7, %v710_v36, %v711_v6  ;;  %v769_v36 = vmul.f32 %v768_v19, %v2368_v26  ;;  %v1510_v19 = vstv %s1862_s8  ;;  %s1851_s8 = sld [smem:[#allocation7 + $0x44]] }
 0x42d   : > { %v678_v55 = vadd.f32 %v676_v50, %v667_v47  ;;  %1354 = vrot.lane.b32.xlu1 %v1352_v49, %s2112_s14  ;;  %1225 = vrot.lane.b32.xlu2 %v1223_v51, %s2111_s10  ;;  %v754_v47 = vsel %vm352_vm1, %v753_v22, %v2487_v41  ;;  %v1256_v50 = vstv %s2531_s16  ;;  %s1824_s16 = sld [smem:[#allocation7 + $0x57]]  ;;  %v1276_v22 = vstv %s1837_s9 }
 0x42e   : > { %1364 = vrot.lane.b32.xlu0 %v1362_v48, %s2111_s10  ;;  %s2613_s9 = sld [smem:[#allocation7 + $0x52]] }
 0x42f   : > { %v700_v3 = vpop.permute.xlu1 %699  ;;  %v688_v59 = vadd.f32 %v686_v11, %v678_v55  ;;  %v786_v61 = vpop.permute.xlu2 %785 }
 0x430   : > { %v742_v9 = vpop.permute.xlu0 %741  ;;  %v701_v60 = vrot.slane %v700_v3, 1  ;;  %v787_v43 = vrot.slane %v786_v61, 1 }
 0x431   : > { %v694_v0 = vadd.f32 %v693_v12, %v688_v59  ;;  %v743_v25 = vrot.slane %v742_v9, 7  ;;  %v1116_v12 = vstv %s2534_s11  ;;  %s1823_s11 = sld [smem:[#allocation7 + $0x50]] }
 0x432   : > { %v702_v7 = vsel %vm629_vm2, %v700_v3, %v701_v60  ;;  %v788_v54 = vsel %vm640_vm7, %v786_v61, %v787_v43  ;;  %v1500_v3 = vstv %s2537_s27  ;;  %v1257_v60 = vmul.f32 %v1256_v50, %v2378_v31  ;;  %s1850_s27 = sld [smem:[#allocation7 + $0x3d]] }
 0x433   : > { %v704_v10 = vadd.f32 %v702_v7, %v694_v0  ;;  %v744_v42 = vsel %vm675_vm10, %v743_v25, %v742_v9  ;;  %v1117_v62 = vmul.f32 %v1116_v12, %v2378_v31  ;;  %v1501_v0 = vmul.f32 %v1500_v3, %v2370_v27 }
 0x434   : > { %v832_v7 = vstv %s2552_s25  ;;  %s1797_s25 = sld [smem:[#allocation7 + $0x2]] }
 0x435   : > { %v714_v17 = vadd.f32 %v712_v15, %v704_v10  ;;  %1235 = vrot.lane.b32.xlu1 %v1233_v14, %s2108_s12  ;;  %1105 = vrot.lane.b32.xlu2 %v1103_v16, %s2113_s15  ;;  %v1266_v16 = vstv %s2555_s3  ;;  %s2603_s3 = sld [smem:[#allocation7 + $0x45]] }
 0x436   : > { %1374 = vrot.lane.b32.xlu0 %v1372_v13, %s2108_s12  ;;  %v1267_v24 = vmul.f32 %v1266_v16, %v2378_v31 }
 0x437   : > { %v732_v21 = vpop.permute.xlu1 %731  ;;  %v724_v23 = vadd.f32 %v722_v18, %v714_v17  ;;  %v816_v30 = vpop.permute.xlu2 %815  ;;  %v1126_v17 = vstv %s2563_s29  ;;  %s1865_s29 = sld [smem:[#allocation7 + $0x3e]] }
 0x438   : > { %v776_v20 = vpop.permute.xlu0 %775  ;;  %v733_v29 = vrot.slane %v732_v21, 7  ;;  %v817_v61 = vrot.slane %v816_v30, 7  ;;  %v1127_v25 = vmul.f32 %v1126_v17, %v2378_v31 }
 0x439   : > { %v777_v28 = vrot.slane %v776_v20, 1 }
 0x43a   : > { %v734_v35 = vsel %vm664_vm9, %v733_v29, %v732_v21  ;;  %v818_v13 = vsel %vm675_vm10, %v817_v61, %v816_v30  ;;  %v833_v21 = vmul.f32 %v832_v7, %v2378_v31  ;;  %v907_v50 = vstv %s1797_s25  ;;  %s2643_s25 = sld [smem:[#allocation7 + $0x58]] }
 0x43b   : > { %v778_v34 = vsel %vm629_vm2, %v776_v20, %v777_v28  ;;  %v736_v37 = vadd.f32 %v734_v35, %v724_v23  ;;  %v1511_v28 = vmul.f32 %v1510_v19, %v2370_v27  ;;  %v1138_v35 = vstv %s1822_s28  ;;  %s2618_s28 = sld [smem:[#allocation7 + $0x4b]] }
 0x43c   : > { %v780_v45 = vadd.f32 %v778_v34, %v769_v36  ;;  %v1137_v34 = vld [vmem:[#allocation2 + $0x3] ss:$2 sm:$0x3]  ;;  %v1520_v36 = vstv %s1863_s13  ;;  %s2620_s13 = sld [smem:[#allocation7 + $0x51]] }
 0x43d   : > { %v746_v46 = vadd.f32 %v744_v42, %v736_v37  ;;  %1245 = vrot.lane.b32.xlu1 %v1243_v40, %s2113_s15  ;;  %1493 = vrot.lane.b32.xlu2 %v1491_v44, %s2112_s14  ;;  %v1277_v37 = vmul.f32 %v1276_v22, %v2386_v38  ;;  %v1521_v40 = vmul.f32 %v1520_v36, %v2370_v27 }
 0x43e   : > { %1384 = vrot.lane.b32.xlu0 %v1382_v39, %s2113_s15  ;;  %v790_v41 = vadd.f32 %v788_v54, %v780_v45  ;;  %v1139_v39 = vmul.f32 %v1138_v35, %v1137_v34  ;;  %v1158_v45 = vstv %s1824_s16  ;;  %s2623_s16 = sld [smem:[#allocation7 + $0x33]] }
 0x43f   : > { %v796_v49 = vpop.permute.xlu1 %795  ;;  %v2557_v51 = vadd.f32 %v754_v47, %v746_v46  ;;  %v2560_v9 = vpop.permute.xlu2 %849  ;;  %v1148_v46 = vstv %s1823_s11  ;;  %v1395_v47 = vstv %s1850_s27  ;;  %v1159_v27 = vmul.f32 %v1158_v45, %v2386_v38  ;;  %s2632_s11 = sld [smem:[#allocation7 + $0x4]] }
 0x440   : > { %v806_v48 = vpop.permute.xlu0 %805  ;;  %v797_v11 = vrot.slane %v796_v49, 1  ;;  %v1396_v54 = vmul.f32 %v1395_v47, %v2378_v31  ;;  %s2637_s27 = sld [smem:[#allocation7 + $0x59]]  ;;  %v851_v47 = vrot.slane %v2560_v9, 1 }
 0x441   : > { %v807_v55 = vrot.slane %v806_v48, 7 }
 0x442   : > { %v798_v59 = vsel %vm651_vm8, %v796_v49, %v797_v11  ;;  %v1149_v49 = vmul.f32 %v1148_v46, %v2386_v38  ;;  %v908_v11 = vmul.f32 %v907_v50, %v2368_v26  ;;  %v1286_v22 = vstv %s2620_s13  ;;  %s2704_s13 = sld [smem:[#allocation7 + $0x53]] }
 0x443   : > { %v800_v6 = vadd.f32 %v798_v59, %v790_v41  ;;  %v808_v63 = vsel %vm664_vm9, %v807_v55, %v806_v48 }
 0x444   : > { %v971_v35 = vstv %s2623_s16  ;;  %s2728_s16 = sld [smem:[#allocation7 + $0x61]] }
 0x445   : > { %v810_v2 = vadd.f32 %v808_v63, %v800_v6  ;;  %1119 = vrot.lane.b32.xlu1 %v1117_v62, %s2110_s26  ;;  %1503 = vrot.lane.b32.xlu2 %v1501_v0, %s2111_s10  ;;  %v1534_v62 = vstv %s1865_s29  ;;  %v1405_v63 = vstv %s1851_s8  ;;  %v972_v46 = vmul.f32 %v971_v35, %v2378_v31  ;;  %s2673_s29 = sld [smem:[#allocation7 + $0x5f]] }
 0x446   : > { %1259 = vrot.lane.b32.xlu0 %v1257_v60, %s2110_s26  ;;  %v1544_v60 = vstv %s2603_s3  ;;  %v1406_v16 = vmul.f32 %v1405_v63, %v2378_v31  ;;  %s2661_s3 = sld [smem:[#allocation7 + $0x5a]] }
 0x447   : > { %v826_v10 = vpop.permute.xlu1 %825  ;;  %v2578_v15 = vpop.permute.xlu2 %879  ;;  %v820_v18 = vadd.f32 %v818_v13, %v810_v2  ;;  %v1545_v7 = vmul.f32 %v1544_v60, %v2378_v31  ;;  %s2680_s8 = sld [smem:[#allocation7 + $0x4c]]  ;;  %v852_v60 = vsel %vm640_vm7, %v2560_v9, %v851_v47 }
 0x448   : > { %v2574_v4 = vpop.permute.xlu0 %839  ;;  %v827_v14 = vrot.slane %v826_v10, 7 }
 0x449   : > { %v841_v36 = vrot.slane %v2574_v4, 1 }
 0x44a   : > { %v828_v20 = vsel %vm352_vm1, %v827_v14, %v826_v10  ;;  %v1535_v10 = vmul.f32 %v1534_v62, %v2378_v31 }
 0x44b   : > { %v830_v23 = vadd.f32 %v828_v20, %v820_v18  ;;  %v1425_v20 = vstv %s2613_s9  ;;  %s2693_s9 = sld [smem:[#allocation7 + $0x3]] }
 0x44d   : > { %v2587_v29 = vadd.f32 %v833_v21, %v830_v23  ;;  %1129 = vrot.lane.b32.xlu1 %v1127_v25, %s2109_s17  ;;  %1513 = vrot.lane.b32.xlu2 %v1511_v28, %s2108_s12  ;;  %v1415_v28 = vstv %s2618_s28  ;;  %s2696_s28 = sld [smem:[#allocation7 + $0x60]] }
 0x44e   : > { %1269 = vrot.lane.b32.xlu0 %v1267_v24, %s2109_s17 }
 0x44f   : > { %v2594_v32 = vpop.permute.xlu1 %859  ;;  %v915_v33 = vpop.permute.xlu2 %914 }
 0x450   : > { %v2592_v30 = vpop.permute.xlu0 %869  ;;  %v916_v48 = vrot.slane %v915_v33, 1 }
 0x451   : > { %v871_v9 = vrot.slane %v2592_v30, 7 }
 0x452   : > { %v917_v55 = vsel %vm629_vm2, %v915_v33, %v916_v48  ;;  %v842_v48 = vsel %vm629_vm2, %v2574_v4, %v841_v36 }
 0x453   : > { %v919_v61 = vadd.f32 %v917_v55, %v908_v11  ;;  %v844_v31 = vadd.f32 %v842_v48, %v2587_v29  ;;  %v1435_v11 = vstv %s2637_s27  ;;  %s1857_s27 = sld [smem:[#allocation7 + $0x6]] }
 0x454   : > { %v1436_v29 = vmul.f32 %v1435_v11, %v2386_v38 }
 0x455   : > { %1141 = vrot.lane.b32.xlu1 %v1139_v39, %s2112_s14  ;;  %1523 = vrot.lane.b32.xlu2 %v1521_v40, %s2113_s15  ;;  %v1426_v39 = vmul.f32 %v1425_v20, %v2386_v38  ;;  %v1416_v40 = vmul.f32 %v1415_v28, %v2386_v38  ;;  %v854_v63 = vadd.f32 %v852_v60, %v844_v31 }
 0x456   : > { %1279 = vrot.lane.b32.xlu0 %v1277_v37, %s2112_s14 }
 0x457   : > { %v2601_v43 = vpop.permute.xlu1 %889  ;;  %v945_v44 = vpop.permute.xlu2 %944 }
 0x458   : > { %v935_v42 = vpop.permute.xlu0 %934  ;;  %v946_v14 = vrot.slane %v945_v44, 7 }
 0x459   : > { %v936_v3 = vrot.slane %v935_v42, 1 }
 0x45a   : > { %v947_v21 = vsel %vm664_vm9, %v946_v14, %v945_v44  ;;  %v1287_v44 = vmul.f32 %v1286_v22, %v2386_v38  ;;  %v872_v22 = vsel %vm664_vm9, %v871_v9, %v2592_v30 }
 0x45b   : > { %v937_v13 = vsel %vm651_vm8, %v935_v42, %v936_v3 }
 0x45d   : > { %1151 = vrot.lane.b32.xlu1 %v1149_v49, %s2111_s10  ;;  %1398 = vrot.lane.b32.xlu2 %v1396_v54, %s2110_s26  ;;  %v1188_v54 = vstv %s2632_s11  ;;  %s2115_s11 = smov 51  }
 0x45e   : > { %1161 = vrot.lane.b32.xlu0 %v1159_v27, %s2108_s12  ;;  %v1189_v4 = vmul.f32 %v1188_v54, %v2368_v26  ;;  %v1564_v54 = vstv %s2704_s13  ;;  %s1645_s13 = scalar_lea.sflag [#allocation5], %s2250_s23 }
 0x45f   : > { %v925_v41 = vpop.permute.xlu1 %924  ;;  %v2615_v6 = vpop.permute.xlu2 %978  ;;  %v1565_v9 = vmul.f32 %v1564_v54, %v2386_v38 }
 0x460   : > { %v965_v12 = vpop.permute.xlu0 %964  ;;  %v926_v59 = vrot.slane %v925_v41, 1 }
 0x461   : > { %v966_v23 = vrot.slane %v965_v12, 7 }
 0x462   : > { %v927_v0 = vsel %vm640_vm7, %v925_v41, %v926_v59  ;;  %v861_v41 = vrot.slane %v2594_v32, 1 }
 0x463   : > { %v929_v2 = vadd.f32 %v927_v0, %v919_v61  ;;  %v967_v42 = vsel %vm352_vm1, %v966_v23, %v965_v12  ;;  %v1296_v12 = vstv %s2643_s25  ;;  %s1834_s25 = sld [smem:[#allocation7 + $0x35]] }
 0x464   : > { %v1297_v61 = vmul.f32 %v1296_v12, %v2386_v38 }
 0x465   : > { %v939_v17 = vadd.f32 %v937_v13, %v929_v2  ;;  %1537 = vrot.lane.b32.xlu1 %v1535_v10, %s2110_s26  ;;  %1408 = vrot.lane.b32.xlu2 %v1406_v16, %s2109_s17  ;;  %s2658_s26 = sld [smem:[#allocation7 + $0x5]]  ;;  %v1574_v16 = vstv %s2661_s3  ;;  %s2118_s3 = smov 45  }
 0x466   : > { %1547 = vrot.lane.b32.xlu0 %v1545_v7, %s2109_s17  ;;  %s2646_s17 = sld [smem:[#allocation7 + $0x5e]]  ;;  %v862_v7 = vsel %vm651_vm8, %v2594_v32, %v861_v41 }
 0x467   : > { %v955_v19 = vpop.permute.xlu1 %954  ;;  %v2640_v25 = vpop.permute.xlu2 %1008  ;;  %v949_v33 = vadd.f32 %v947_v21, %v939_v17  ;;  %v1306_v17 = vstv %s2673_s29  ;;  %v864_v32 = vadd.f32 %v862_v7, %v854_v63  ;;  %v1554_v21 = vstv %s2680_s8  ;;  %s2119_s29 = smov 46  }
 0x468   : > { %v2634_v18 = vpop.permute.xlu0 %998  ;;  %v956_v24 = vrot.slane %v955_v19, 7  ;;  %v1307_v28 = vmul.f32 %v1306_v17, %v2386_v38 }
 0x469   : > { %v874_v36 = vadd.f32 %v872_v22, %v864_v32 }
 0x46a   : > { %v957_v34 = vsel %vm675_vm10, %v956_v24, %v955_v19  ;;  %v1575_v24 = vmul.f32 %v1574_v16, %v2386_v38 }
 0x46b   : > { %v959_v37 = vadd.f32 %v957_v34, %v949_v33  ;;  %v1327_v14 = vstv %s2658_s26  ;;  %v881_v33 = vrot.slane %v2578_v15, 7  ;;  %v891_v34 = vrot.slane %v2601_v43, 7  ;;  %s1864_s26 = sld [smem:[#allocation7 + $0x37]] }
 0x46c   : > { %v1168_v59 = vstv %s2646_s17  ;;  %v1328_v23 = vmul.f32 %v1327_v14, %v2368_v26  ;;  %s1849_s17 = sld [smem:[#allocation7 + $0x36]] }
 0x46d   : > { %v969_v45 = vadd.f32 %v967_v42, %v959_v37  ;;  %1418 = vrot.lane.b32.xlu1 %v1416_v40, %s2112_s14  ;;  %1289 = vrot.lane.b32.xlu2 %v1287_v44, %s2111_s10  ;;  %v1169_v2 = vmul.f32 %v1168_v59, %v2386_v38  ;;  %v980_v40 = vrot.slane %v2615_v6, 1  ;;  %v1046_v42 = vstv %s2693_s9 }
 0x46e   : > { %1428 = vrot.lane.b32.xlu0 %v1426_v39, %s2111_s10  ;;  %v1555_v39 = vmul.f32 %v1554_v21, %v2386_v38  ;;  %v1445_v44 = vstv %s2696_s28  ;;  %v882_v30 = vsel %vm675_vm10, %v881_v33, %v2578_v15  ;;  %v1047_v15 = vmul.f32 %v1046_v42, %v2368_v26 }
 0x46f   : > { %v2668_v49 = vpop.permute.xlu1 %988  ;;  %v2670_v50 = vadd.f32 %v972_v46, %v969_v45  ;;  %v1196_v55 = vpop.permute.xlu2 %1195  ;;  %v892_v45 = vsel %vm352_vm1, %v891_v34, %v2601_v43  ;;  %v884_v31 = vadd.f32 %v882_v30, %v874_v36  ;;  %v1446_v43 = vmul.f32 %v1445_v44, %v2386_v38  ;;  %v1980_v34 = vld [vmem:[#allocation2 + $0x3] ss:$2 sm:$0x7] }
 0x470   : > { %v2666_v27 = vpop.permute.xlu0 %1028  ;;  %v1197_v3 = vrot.slane %v1196_v55, 1  ;;  %v990_v46 = vrot.slane %v2668_v49, 1  ;;  %v1010_v38 = vrot.slane %v2640_v25, 7 }
 0x471   : > { %v1030_v42 = vrot.slane %v2666_v27, 7 }
 0x472   : > { %v1198_v62 = vsel %vm629_vm2, %v1196_v55, %v1197_v3  ;;  %v981_v3 = vsel %vm629_vm2, %v2615_v6, %v980_v40  ;;  %v1011_v36 = vsel %vm664_vm9, %v1010_v38, %v2640_v25 }
 0x473   : > { %v1200_v0 = vadd.f32 %v1198_v62, %v1189_v4  ;;  %v894_v4 = vadd.f32 %v892_v45, %v884_v31  ;;  %v983_v60 = vadd.f32 %v981_v3, %v2670_v50  ;;  %v1000_v50 = vrot.slane %v2634_v18, 1 }
 0x475   : > { %1299 = vrot.lane.b32.xlu1 %v1297_v61, %s2108_s12  ;;  %1171 = vrot.lane.b32.xlu2 %v1169_v2, %s2113_s15  ;;  %v991_v61 = vsel %vm640_vm7, %v2668_v49, %v990_v46 }
 0x476   : > { %1438 = vrot.lane.b32.xlu0 %v1436_v29, %s2108_s12  ;;  %v993_v16 = vadd.f32 %v991_v61, %v983_v60  ;;  %v1981_v60 = vld [vmem:[#allocation2 + $0x1] ss:$2 sm:$0x7] }
 0x477   : > { %v2699_v13 = vpop.permute.xlu1 %1018  ;;  %v1335_v19 = vpop.permute.xlu2 %1334 }
 0x478   : > { %v1064_v10 = vpop.permute.xlu0 %1063  ;;  %v1336_v20 = vrot.slane %v1335_v19, 1 }
 0x479   : > { %v1065_v55 = vrot.slane %v1064_v10, 1 }
 0x47a   : > { %v1337_v35 = vsel %vm629_vm2, %v1335_v19, %v1336_v20  ;;  %v1584_v19 = vstv %s2728_s16  ;;  %v1020_v20 = vrot.slane %v2699_v13, 7 }
 0x47b   : > { %v1339_v37 = vadd.f32 %v1337_v35, %v1328_v23  ;;  %v1066_v26 = vsel %vm640_vm7, %v1064_v10, %v1065_v55  ;;  %v1001_v10 = vsel %vm651_vm8, %v2634_v18, %v1000_v50  ;;  %v1585_v35 = vmul.f32 %v1980_v34, %v1584_v19 }
 0x47c   : > { %v1003_v23 = vadd.f32 %v1001_v10, %v993_v16  ;;  %v1021_v18 = vsel %vm675_vm10, %v1020_v20, %v2699_v13 }
 0x47d   : > { %1309 = vrot.lane.b32.xlu1 %v1307_v28, %s2113_s15  ;;  %1557 = vrot.lane.b32.xlu2 %v1555_v39, %s2112_s14  ;;  %s2114_s14 = smov 50  }
 0x47e   : > { %1577 = vrot.lane.b32.xlu0 %v1575_v24, %s2108_s12  ;;  %v1013_v39 = vadd.f32 %v1011_v36, %v1003_v23 }
 0x47f   : > { %v1054_v48 = vpop.permute.xlu1 %1053  ;;  %v1345_v41 = vpop.permute.xlu2 %1344 }
 0x480   : > { %v1206_v47 = vpop.permute.xlu0 %1205  ;;  %v1055_v12 = vrot.slane %v1054_v48, 1  ;;  %v1346_v59 = vrot.slane %v1345_v41, 1  ;;  %v1023_v25 = vadd.f32 %v1021_v18, %v1013_v39 }
 0x481   : > { %v1207_v11 = vrot.slane %v1206_v47, 1 }
 0x482   : > { %v1056_v29 = vsel %vm629_vm2, %v1054_v48, %v1055_v12  ;;  %v1347_v6 = vsel %vm640_vm7, %v1345_v41, %v1346_v59 }
 0x483   : > { %v1208_v62 = vsel %vm640_vm7, %v1206_v47, %v1207_v11  ;;  %v1058_v2 = vadd.f32 %v1056_v29, %v1047_v15  ;;  %v2741_v7 = vadd.f32 %v1347_v6, %v1339_v37  ;;  %v1466_v15 = vstv %s1857_s27  ;;  %s2048_s27 = scalar_lea.hbm %s2894_s5, 128 }
 0x484   : > { %v1210_v63 = vadd.f32 %v1208_v62, %v1200_v0 }
 0x485   : > { %1448 = vrot.lane.b32.xlu1 %v1446_v43, %s2113_s15  ;;  %v1068_v14 = vadd.f32 %v1066_v26, %v1058_v2  ;;  %1567 = vrot.lane.b32.xlu2 %v1565_v9, %s2111_s10  ;;  %s2754_s10 = sld [smem:[#allocation7 + $0x34]] }
 0x486   : > { %898 = vrot.lane.b32.xlu0 %v894_v4, %s2114_s14 }
 0x487   : > { %v1076_v0 = vpop.permute.xlu1 %1075  ;;  %v1226_v32 = vpop.permute.xlu2 %1225 }
 0x488   : > { %v1216_v49 = vpop.permute.xlu0 %1215  ;;  %v1227_v21 = vrot.slane %v1226_v32, 7  ;;  %v1077_v28 = vrot.slane %v1076_v0, 7 }
 0x489   : > { %v1217_v17 = vrot.slane %v1216_v49, 7 }
 0x48a   : > { %v1228_v22 = vsel %vm664_vm9, %v1227_v21, %v1226_v32  ;;  %v1078_v40 = vsel %vm651_vm8, %v1077_v28, %v1076_v0 }
 0x48b   : > { %v1218_v24 = vsel %vm651_vm8, %v1217_v17, %v1216_v49  ;;  %v1080_v47 = vadd.f32 %v1078_v40, %v1068_v14  ;;  %v1112_v12 = vstv %s2754_s10 }
 0x48c   : > { %v1220_v33 = vadd.f32 %v1218_v24, %v1210_v63  ;;  %v1113_v62 = vmul.f32 %v1981_v60, %v1112_v12 }
 0x48d   : > { %759 = vrot.lane.b32.xlu1 %v2557_v51, %s2115_s11  ;;  %1587 = vrot.lane.b32.xlu2 %v1585_v35, %s2113_s15  ;;  %v1031_v51 = vsel %vm352_vm1, %v1030_v42, %v2666_v27  ;;  %s2116_s15 = smov 49   ;;  %v1982_v27 = vld [vmem:[#allocation2] ss:$2 sm:$0x7] }
 0x48e   : > { %v2760_v37 = vadd.f32 %v1228_v22, %v1220_v33  ;;  %v1033_v11 = vadd.f32 %v1031_v51, %v1023_v25  ;;  %v1467_v2 = vmul.f32 %v1982_v27, %v1466_v15 }
 0x48f   : > { %v1086_v30 = vpop.permute.xlu1 %1085  ;;  %v1106_v13 = vpop.permute.xlu2 %1105 }
 0x490   : > { %v1096_v44 = vpop.permute.xlu0 %1095  ;;  %v1087_v46 = vrot.slane %v1086_v30, 7  ;;  %v1107_v54 = vrot.slane %v1106_v13, 7 }
 0x491   : > { %v1097_v45 = vrot.slane %v1096_v44, 7 }
 0x492   : > { %v1088_v48 = vsel %vm664_vm9, %v1087_v46, %v1086_v30  ;;  %v1108_v3 = vsel %vm352_vm1, %v1107_v54, %v1106_v13  ;;  %v1391_v54 = vstv %s1849_s17 }
 0x493   : > { %v1090_v31 = vadd.f32 %v1088_v48, %v1080_v47  ;;  %v1098_v55 = vsel %vm675_vm10, %v1097_v45, %v1096_v44  ;;  %v1252_v45 = vstv %s1834_s25 }
 0x495   : > { %v1100_v41 = vadd.f32 %v1098_v55, %v1090_v31  ;;  %1037 = vrot.lane.b32.xlu2 %v1033_v11, %s2116_s15  ;;  %v1530_v55 = vstv %s1864_s26 }
 0x497   : > { %v1110_v59 = vadd.f32 %v1108_v3, %v1100_v41  ;;  %v1474_v4 = vpop.permute.xlu1 %1473  ;;  %v1494_v63 = vpop.permute.xlu2 %1493  ;;  %v1253_v3 = vmul.f32 %v1981_v60, %v1252_v45 }
 0x498   : > { %v1484_v43 = vpop.permute.xlu0 %1483  ;;  %v1475_v61 = vrot.slane %v1474_v4, 1  ;;  %v1495_v9 = vrot.slane %v1494_v63, 7 }
 0x499   : > { %v1485_v29 = vrot.slane %v1484_v43, 1  ;;  %v2772_v6 = vadd.f32 %v1113_v62, %v1110_v59 }
 0x49a   : > { %v1476_v26 = vsel %vm629_vm2, %v1474_v4, %v1475_v61  ;;  %v1496_v49 = vsel %vm651_vm8, %v1495_v9, %v1494_v63  ;;  %v1392_v4 = vmul.f32 %v1981_v60, %v1391_v54 }
 0x49b   : > { %v1478_v50 = vadd.f32 %v1476_v26, %v1467_v2  ;;  %v1486_v14 = vsel %vm640_vm7, %v1484_v43, %v1485_v29  ;;  %v1531_v29 = vmul.f32 %v1981_v60, %v1530_v55 }
 0x49d   : > { %v1488_v16 = vadd.f32 %v1486_v14, %v1478_v50 }
 0x49f   : > { %v1498_v0 = vadd.f32 %v1496_v49, %v1488_v16  ;;  %v1355_v32 = vpop.permute.xlu1 %1354  ;;  %v1504_v38 = vpop.permute.xlu2 %1503 }
 0x4a0   : > { %v1365_v17 = vpop.permute.xlu0 %1364  ;;  %v1356_v10 = vrot.slane %v1355_v32, 7  ;;  %v1505_v35 = vrot.slane %v1504_v38, 7 }
 0x4a1   : > { %v1366_v19 = vrot.slane %v1365_v17, 7 }
 0x4a2   : > { %v1357_v20 = vsel %vm651_vm8, %v1356_v10, %v1355_v32  ;;  %v1506_v42 = vsel %vm664_vm9, %v1505_v35, %v1504_v38 }
 0x4a3   : > { %v1359_v21 = vadd.f32 %v1357_v20, %v2741_v7  ;;  %v1367_v23 = vsel %vm664_vm9, %v1366_v19, %v1365_v17  ;;  %v1508_v46 = vadd.f32 %v1506_v42, %v1498_v0 }
 0x4a5   : > { %v1369_v24 = vadd.f32 %v1367_v23, %v1359_v21 }
 0x4a7   : > { %v1236_v33 = vpop.permute.xlu1 %1235  ;;  %v1514_v34 = vpop.permute.xlu2 %1513 }
 0x4a8   : > { %v1375_v28 = vpop.permute.xlu0 %1374  ;;  %v1237_v18 = vrot.slane %v1236_v33, 7  ;;  %v1515_v40 = vrot.slane %v1514_v34, 7 }
 0x4a9   : > { %v1376_v22 = vrot.slane %v1375_v28, 7 }
 0x4aa   : > { %v1238_v7 = vsel %vm675_vm10, %v1237_v18, %v1236_v33  ;;  %v1516_v44 = vsel %vm675_vm10, %v1515_v40, %v1514_v34 }
 0x4ab   : > { %v1377_v36 = vsel %vm675_vm10, %v1376_v22, %v1375_v28  ;;  %v1240_v51 = vadd.f32 %v1238_v7, %v2760_v37  ;;  %v1518_v11 = vadd.f32 %v1516_v44, %v1508_v46 }
 0x4ac   : > { %v1379_v39 = vadd.f32 %v1377_v36, %v1369_v24 }
 0x4af   : > { %v1246_v25 = vpop.permute.xlu1 %1245  ;;  %v1524_v48 = vpop.permute.xlu2 %1523 }
 0x4b0   : > { %v1385_v30 = vpop.permute.xlu0 %1384  ;;  %v1247_v47 = vrot.slane %v1246_v25, 7  ;;  %v1525_v31 = vrot.slane %v1524_v48, 7 }
 0x4b1   : > { %v1386_v13 = vrot.slane %v1385_v30, 7 }
 0x4b2   : > { %v1248_v41 = vsel %vm352_vm1, %v1247_v47, %v1246_v25  ;;  %v1526_v43 = vsel %vm352_vm1, %v1525_v31, %v1524_v48 }
 0x4b3   : > { %v1387_v12 = vsel %vm352_vm1, %v1386_v13, %v1385_v30  ;;  %v1250_v59 = vadd.f32 %v1248_v41, %v1240_v51  ;;  %v1528_v62 = vadd.f32 %v1526_v43, %v1518_v11 }
 0x4b4   : > { %v1389_v15 = vadd.f32 %v1387_v12, %v1379_v39 }
 0x4b5   : > { %v1254_v61 = vadd.f32 %v1253_v3, %v1250_v59  ;;  %v1532_v27 = vadd.f32 %v1531_v29, %v1528_v62 }
 0x4b6   : > { %v2788_v63 = vadd.f32 %v1392_v4, %v1389_v15 }
 0x4b7   : > { %v1120_v2 = vpop.permute.xlu1 %1119  ;;  %v1399_v26 = vpop.permute.xlu2 %1398 }
 0x4b8   : > { %v1260_v37 = vpop.permute.xlu0 %1259  ;;  %v1121_v16 = vrot.slane %v1120_v2, 1  ;;  %v1400_v59 = vrot.slane %v1399_v26, 1 }
 0x4b9   : > { %v1261_v46 = vrot.slane %v1260_v37, 1 }
 0x4ba   : > { %v1122_v19 = vsel %vm629_vm2, %v1120_v2, %v1121_v16 }
 0x4bb   : > { %v1124_v38 = vadd.f32 %v1122_v19, %v2772_v6  ;;  %v1262_v54 = vsel %vm629_vm2, %v1260_v37, %v1261_v46 }
 0x4bc   : > { %v1264_v12 = vadd.f32 %v1262_v54, %v1254_v61 }
 0x4bf   : > { %v1130_v50 = vpop.permute.xlu1 %1129  ;;  %v1409_v14 = vpop.permute.xlu2 %1408 }
 0x4c0   : > { %v1270_v9 = vpop.permute.xlu0 %1269  ;;  %v1131_v17 = vrot.slane %v1130_v50, 1  ;;  %v1410_v62 = vrot.slane %v1409_v14, 1 }
 0x4c1   : > { %v1271_v47 = vrot.slane %v1270_v9, 1 }
 0x4c2   : > { %v1132_v60 = vsel %vm640_vm7, %v1130_v50, %v1131_v17  ;;  %v1411_v61 = vsel %vm640_vm7, %v1409_v14, %v1410_v62 }
 0x4c3   : > { %v1134_v21 = vadd.f32 %v1132_v60, %v1124_v38  ;;  %v1272_v55 = vsel %vm640_vm7, %v1270_v9, %v1271_v47  ;;  %v1401_v9 = vsel %vm629_vm2, %v1399_v26, %v1400_v59 }
 0x4c4   : > { %v1274_v4 = vadd.f32 %v1272_v55, %v1264_v12 }
 0x4c7   : > { %v1142_v0 = vpop.permute.xlu1 %1141  ;;  %v1290_v32 = vpop.permute.xlu2 %1289 }
 0x4c8   : > { %v1280_v49 = vpop.permute.xlu0 %1279  ;;  %v1143_v10 = vrot.slane %v1142_v0, 7  ;;  %v1291_v29 = vrot.slane %v1290_v32, 7 }
 0x4c9   : > { %v1281_v51 = vrot.slane %v1280_v49, 7 }
 0x4ca   : > { %v1144_v20 = vsel %vm651_vm8, %v1143_v10, %v1142_v0  ;;  %v1292_v10 = vsel %vm664_vm9, %v1291_v29, %v1290_v32 }
 0x4cb   : > { %v1146_v34 = vadd.f32 %v1144_v20, %v1134_v21  ;;  %v1282_v43 = vsel %vm651_vm8, %v1281_v51, %v1280_v49  ;;  %v1403_v20 = vadd.f32 %v1401_v9, %v2788_v63 }
 0x4cc   : > { %v1284_v0 = vadd.f32 %v1282_v43, %v1274_v4  ;;  %v1796_v43 = vld [vmem:[%s2893_s4 + $0x1] ss:$8 sm:$0x3] }
 0x4ce   : > { %v1294_v21 = vadd.f32 %v1292_v10, %v1284_v0  ;;  %v1826_v0 = vld [vmem:[%s2893_s4 + $0x3] ss:$8 sm:$0x3] }
 0x4cf   : > { %v1152_v24 = vpop.permute.xlu1 %1151  ;;  %v1172_v22 = vpop.permute.xlu2 %1171 }
 0x4d0   : > { %v1162_v23 = vpop.permute.xlu0 %1161  ;;  %v1153_v33 = vrot.slane %v1152_v24, 7  ;;  %v1173_v36 = vrot.slane %v1172_v22, 7 }
 0x4d1   : > { %v1163_v28 = vrot.slane %v1162_v23, 7 }
 0x4d2   : > { %v1154_v35 = vsel %vm664_vm9, %v1153_v33, %v1152_v24  ;;  %v1174_v42 = vsel %vm352_vm1, %v1173_v36, %v1172_v22 }
 0x4d3   : > { %v1156_v18 = vadd.f32 %v1154_v35, %v1146_v34  ;;  %v1164_v39 = vsel %vm675_vm10, %v1163_v28, %v1162_v23  ;;  %v1413_v34 = vadd.f32 %v1411_v61, %v1403_v20 }
 0x4d5   : > { %v1166_v40 = vadd.f32 %v1164_v39, %v1156_v18 }
 0x4d7   : > { %v1176_v7 = vadd.f32 %v1174_v42, %v1166_v40  ;;  %v1538_v44 = vpop.permute.xlu1 %1537  ;;  %v1558_v30 = vpop.permute.xlu2 %1557 }
 0x4d8   : > { %v1548_v6 = vpop.permute.xlu0 %1547  ;;  %v1539_v13 = vrot.slane %v1538_v44, 1  ;;  %v1559_v50 = vrot.slane %v1558_v30, 7 }
 0x4d9   : > { %1180 = vrot.lane.b32.xlu1 %v1176_v7, %s2108_s12  ;;  %v1549_v11 = vrot.slane %v1548_v6, 1  ;;  %s2117_s12 = smov 47  }
 0x4da   : > { %v1540_v31 = vsel %vm629_vm2, %v1538_v44, %v1539_v13  ;;  %v1560_v49 = vsel %vm651_vm8, %v1559_v50, %v1558_v30 }
 0x4db   : > { %v1542_v41 = vadd.f32 %v1540_v31, %v1532_v27  ;;  %v1550_v2 = vsel %vm640_vm7, %v1548_v6, %v1549_v11 }
 0x4dd   : > { %v1552_v17 = vadd.f32 %v1550_v2, %v1542_v41 }
 0x4df   : > { %v1419_v45 = vpop.permute.xlu1 %1418  ;;  %v1568_v48 = vpop.permute.xlu2 %1567  ;;  %v1562_v23 = vadd.f32 %v1560_v49, %v1552_v17  ;;  %v1841_v49 = vld [vmem:[%s2893_s4 + $0x4] ss:$8 sm:$0x3] }
 0x4e0   : > { %v1429_v25 = vpop.permute.xlu0 %1428  ;;  %v1569_v37 = vrot.slane %v1568_v48, 7  ;;  %v1420_v19 = vrot.slane %v1419_v45, 7 }
 0x4e1   : > { %v1430_v36 = vrot.slane %v1429_v25, 7 }
 0x4e2   : > { %v1570_v60 = vsel %vm664_vm9, %v1569_v37, %v1568_v48  ;;  %v1421_v26 = vsel %vm651_vm8, %v1420_v19, %v1419_v45  ;;  %v1811_v37 = vld [vmem:[%s2893_s4 + $0x2] ss:$8 sm:$0x3] }
 0x4e3   : > { %v1572_v35 = vadd.f32 %v1570_v60, %v1562_v23  ;;  %v1423_v42 = vadd.f32 %v1421_v26, %v1413_v34  ;;  %v1431_v30 = vsel %vm664_vm9, %v1430_v36, %v1429_v25 }
 0x4e5   : > { %v1433_v46 = vadd.f32 %v1431_v30, %v1423_v42 }
 0x4e7   : > { %v1300_v15 = vpop.permute.xlu1 %1299  ;;  %v1588_v27 = vpop.permute.xlu2 %1587 }
 0x4e8   : > { %v1439_v3 = vpop.permute.xlu0 %1438  ;;  %v1301_v16 = vrot.slane %v1300_v15, 7  ;;  %v1589_v33 = vrot.slane %v1588_v27, 7 }
 0x4e9   : > { %v1440_v18 = vrot.slane %v1439_v3, 7 }
 0x4ea   : > { %v1302_v38 = vsel %vm675_vm10, %v1301_v16, %v1300_v15  ;;  %v1590_v6 = vsel %vm352_vm1, %v1589_v33, %v1588_v27 }
 0x4eb   : > { %v1304_v32 = vadd.f32 %v1302_v38, %v1294_v21  ;;  %v1441_v45 = vsel %vm675_vm10, %v1440_v18, %v1439_v3  ;;  %v757_v3 = vld [vmem:[%s2893_s4] ss:$8 sm:$0x3]  ;;  %v1856_v21 = vld [vmem:[%s2893_s4 + $0x5] ss:$8 sm:$0x3] }
 0x4ec   : > { %v1443_v48 = vadd.f32 %v1441_v45, %v1433_v46 }
 0x4ef   : > { %v1310_v28 = vpop.permute.xlu1 %1309  ;;  %v1038_v12 = vpop.permute.xlu2 %1037 }
 0x4f0   : > { %v1578_v24 = vpop.permute.xlu0 %1577  ;;  %v1311_v14 = vrot.slane %v1310_v28, 7  ;;  %v1039_v59 = vrot.slane %v1038_v12, 1 }
 0x4f1   : > { %v1579_v22 = vrot.slane %v1578_v24, 7 }
 0x4f2   : > { %v1312_v40 = vsel %vm352_vm1, %v1311_v14, %v1310_v28 }
 0x4f3   : > { %v1580_v39 = vsel %vm675_vm10, %v1579_v22, %v1578_v24  ;;  %v1314_v7 = vadd.f32 %v1312_v40, %v1304_v32  ;;  %v1871_v22 = vld [vmem:[%s2893_s4 + $0x6] ss:$8 sm:$0x3] }
 0x4f4   : > { %v1582_v63 = vadd.f32 %v1580_v39, %v1572_v35 }
 0x4f5   : > { %1318 = vrot.lane.b32.xlu0 %v1314_v7, %s2117_s12 }
 0x4f6   : > { %v1592_v44 = vadd.f32 %v1590_v6, %v1582_v63 }
 0x4f7   : > { %v1449_v13 = vpop.permute.xlu1 %1448 }
 0x4f8   : > { %1596 = vrot.lane.b32.xlu1 %v1592_v44, %s2118_s3  ;;  %v1450_v47 = vrot.slane %v1449_v13, 7  ;;  %v899_v55 = vpop.permute.xlu0 %898  ;;  %s1879_s3 = sshll.u32 %s2173_s22, 6  ;;  %s1657_s22 = sshll.u32 %s2264_s7, 4  ;;  %s1658_s22 = int_to_ptr.vmem [resolvable:$true] %s1657_s22 }
 0x4f9   : > { %v900_v41 = vrot.slane %v899_v55, 1  ;;  %s1656_s9 = scalar_lea.hbm %s2894_s5, %s1879_s3 }
 0x4fa   : > { %v1451_v54 = vsel %vm352_vm1, %v1450_v47, %v1449_v13  ;;  %vm1040_vm1 = vcmask 400384   ;;  %s1659_s28 = sshll.u32 %s1656_s9, 4  ;;  %s1660_s28 = int_to_ptr.hbm [resolvable:$true] %s1659_s28 }
 0x4fb   : > { %v1453_v51 = vadd.f32 %v1451_v54, %v1443_v48  ;;  %v902_v4 = vsel %vm901_vm12, %v899_v55, %v900_v41  ;;  %v1041_v16 = vsel %vm1040_vm1, %v1038_v12, %v1039_v59  ;;  %s2042_s16 = sshra.s32 %s1660_s28, 4  ;;  %s2043_s16 = int_to_ptr.hbm [resolvable:$true] %s2042_s16 }
 0x4fc   : > { %v904_v2 = vmul.f32 %v1796_v43, %v902_v4  ;;  %v1043_v61 = vmul.f32 %v1811_v37, %v1041_v16  ;;  %s2044_s14 = scalar_lea.hbm %s2043_s16, 64  ;;  %p2049_p0 = scmp.lt.s32.totalorder %s2043_s16, %s2894_s5 }
 0x4fd   : > { %1457 = vrot.lane.b32.xlu2 %v1453_v51, %s2119_s29  ;;  %p2045_p4 = scmp.ne.s32.totalorder %s2043_s16, %s2044_s14  ;;  %p2050_p8 = scmp.lt.s32.totalorder %s2048_s27, %s2044_s14 }
 0x4ff   : > { %v760_v31 = vpop.permute.xlu1 %759  ;;  %p2046_p6 = pnand %p2045_p4, %p2204_p11  ;;  %p2051_p5 = por %p2050_p8, %p2049_p0 }
 0x500   : > { %v761_v11 = vrot.slane %v760_v31, 1 }
 0x501   : > { %p2047_p1 = pneg %p2046_p6 }
 0x502   : > { %v763_v15 = vsel %vm762_vm11, %v760_v31, %v761_v11 }
 0x503   : > { %v765_v29 = vmul.f32 %v763_v15, %v757_v3  ;;  %p2052_p9 = pnand %p2051_p5, %p2047_p1 }
 0x505   : > { %v905_v9 = vadd.f32 %v904_v2, %v765_v29 }
 0x507   : > { %v1044_v38 = vadd.f32 %v1043_v61, %v905_v9 }
 0x54b   : > { %v1181_v25 = vpop.permute.xlu1 %1180 }
 0x54c   : > { %v1182_v62 = vrot.slane %v1181_v25, 1 }
 0x54e   : > { %v1183_v17 = vsel %vm675_vm10, %v1181_v25, %v1182_v62 }
 0x54f   : > { %v1185_v27 = vmul.f32 %v1826_v0, %v1183_v17 }
 0x551   : > { %v1186_v26 = vadd.f32 %v1185_v27, %v1044_v38 }
 0x557   : > { %v1458_v50 = vpop.permute.xlu2 %1457 }
 0x558   : > { %v1459_v19 = vrot.slane %v1458_v50, 1 }
 0x55a   : > { %v1461_v23 = vsel %vm1460_vm13, %v1458_v50, %v1459_v19 }
 0x55b   : > { %v1463_v34 = vmul.f32 %v1856_v21, %v1461_v23 }
 0x567   : > { %v1319_v10 = vpop.permute.xlu0 %1318 }
 0x568   : > { %v1320_v60 = vrot.slane %v1319_v10, 1 }
 0x56a   : > { %v1597_v20 = vpop.permute.xlu1 %1596  ;;  %v1322_v24 = vsel %vm1321_vm14, %v1319_v10, %v1320_v60 }
 0x56b   : > { %v1598_v28 = vrot.slane %v1597_v20, 1  ;;  %v1324_v33 = vmul.f32 %v1841_v49, %v1322_v24 }
 0x56d   : > { %v1600_v14 = vsel %vm1599_vm15, %v1597_v20, %v1598_v28  ;;  %v1325_v35 = vadd.f32 %v1324_v33, %v1186_v26 }
 0x56e   : > { %v1602_v36 = vmul.f32 %v1871_v22, %v1600_v14 }
 0x56f   : > { %v1464_v32 = vadd.f32 %v1463_v34, %v1325_v35 }
 0x571   : > { %v1603_v18 = vadd.f32 %v1602_v36, %v1464_v32 }
 0x573   : > { %v1872_v39 = vmul.f32 -1.442695, %v1603_v18 }
 0x575   : > { %1976 = vpow2.f32 %v1872_v39 }
 0x57b   : > { %v1977_v40 = vpop.eup %1976 }
 0x57c   : > { %v1607_v42 = vadd.f32 1.0, %v1977_v40 }
 0x57e   : > { %1978 = vrcp.f32 %v1607_v42  ;;  %v1619_v44 = vand.u32 2147483648, %v1607_v42  ;;  %v1617_v45 = vand.u32 2147483647, %v1607_v42  ;;  %vm1613_vm3 = vweird.f32 %v1607_v42 }
 0x580   : > { %v1620_v13 = vor.u32 1.1754944e-38, %v1619_v44  ;;  %vm1618_vm5 = vcmp.eq.f32.partialorder %v1617_v45, 8.507059e+37 }
 0x584   : > { %v1979_v63 = vpop.eup %1978 }
 0x585   : > { %v1609_v7 = vmul.f32 %v1979_v63, %v1607_v42  ;;  %vm1614_vm0 = vweird.f32 %v1979_v63 }
 0x586   : > { %vm1615_vm4 = vmor %vm1613_vm3, %vm1614_vm0 }
 0x587   : > { %v1610_v6 = vsub.f32 1.0, %v1609_v7 }
 0x589   : > { %v1611_v30 = vmul.f32 %v1979_v63, %v1610_v6 }
 0x58b   : > { %v1612_v46 = vadd.f32 %v1979_v63, %v1611_v30 }
 0x58d   : > { %v1616_v47 = vsel %vm1615_vm4, %v1979_v63, %v1612_v46 }
 0x58e   : > { %v1621_v48 = vsel %vm1618_vm5, %v1620_v13, %v1616_v47 }
 0x58f   : > { %v1624_v54 = vperm.slane %v1621_v48, 0  ;;  %v1625_v51 = vperm.slane %v1621_v48, 1 }
 0x591   : > { %v1628_v31 = vmul.f32 %v1624_v54, %v2337_v57  ;;  %v1629_v55 = vmul.f32 %v1625_v51, %v2354_v5  ;;  %v1630_v11 = vmul.f32 %v1624_v54, %v2334_v56  ;;  %v1631_v12 = vmul.f32 %v1625_v51, %v2350_v1 }
 0x592   : > { %v1632_v41 = vmul.f32 %v1624_v54, %v2329_v53  ;;  %v1633_v25 = vmul.f32 %v1625_v51, %v2346_v58  ;;  %v1634_v56 = vmul.f32 %v1624_v54, %v2326_v52  ;;  %v1635_v57 = vmul.f32 %v1625_v51, %v2341_v8 }
 0x593   : > { %1636 = vst [vmem:[%s2264_s7] sm:$0xff] %v1628_v31 }
 0x594   : > { %1637 = vst [vmem:[%s2264_s7 + $0x8] sm:$0xff] %v1629_v55 }
 0x595   : > { %1638 = vst [vmem:[%s2264_s7 + $0x10] sm:$0xff] %v1630_v11 }
 0x596   : > { %1639 = vst [vmem:[%s2264_s7 + $0x18] sm:$0xff] %v1631_v12 }
 0x597   : > { %1640 = vst [vmem:[%s2264_s7 + $0x20] sm:$0xff] %v1632_v41 }
 0x598   : > { %1641 = vst [vmem:[%s2264_s7 + $0x28] sm:$0xff] %v1633_v25 }
 0x599   : > { %1642 = vst [vmem:[%s2264_s7 + $0x30] sm:$0xff] %v1634_v56 }
 0x59a   : > { %1643 = vst [vmem:[%s2264_s7 + $0x38] sm:$0xff] %v1635_v57 }
 0x59b   : > { %2055 = shalt.err (!%p2052_p9)
}
 0x59c   : > { %s2120_s23 = smov 256   ;;  %s2121_s7 = smov 16  }
 0x59d   : > { %1886 = dma.vmem_to_hbm [thread:$0]  (%p2204_p11), %s1658_s22, 1024, %s1660_s28, %s1645_s13, %s2120_s23, %s2120_s23, %s2121_s7  }
 0x59e PF: > { %s1674_s17 = sand.u32 1, %s2086_s18   ;;  %p2905_p10 = scmp.ge.s32.totalorder %s2098_s21, 2 }
 0x59f   : > { %s1675_s26 = scalar_lea.sflag [#allocation5], %s1674_s17 }
 0x5a0   : > { %p1897_p2 = pnand %p2905_p10, %p2208_p12 }
 0x5a2   : > { %p1898_p7 = pneg %p1897_p2 }
 0x5a4   : > { %2081 = dma.done.wait (%p1898_p7), %s1675_s26, 1024  }
 0x5a5   : > { %2083 = vsyncadd (%p1898_p7), %s1675_s26, 4294966272  ;;  %s2906_s12 = sld [smem:[#allocation12_spill]]  ;;  %p19_p3 = scmp.ge.s32.totalorder %s2177_s24, 4  }
 0x5a6   : > { %s2907_s18 = smov %s2090_s19  ;;  %s2908_s19 = smov %s2094_s20 }
 0x5a7   : > { %s2910_s21 = smov %s2177_s24  ;;  %21 = sbr.rel (!%p19_p3) target bundleno = 8 (0x8), region = 105 }
 0x5ab   : > { %s2909_s20 = smov %s2906_s12 }
 0x5ac   :  { %1681 = vsyncpa [#allocation4], 1 }
 0x5ad   :  { %1683 = vsyncpa [#allocation4 + $0x1], 1 }
 0x5ae   :  { %1684 = vsyncpa [#allocation5], 1 }
 0x5af   :  { %1686 = vsyncpa [#allocation5 + $0x1], 1 }
 0x5b0   :  { %1687 = vsyncpa [#allocation6], 1 }
 0x5b1   :  { %1689 = vsyncpa [#allocation6 + $0x1], 1 }

</bundles_post_ra>
